<compile_context>
chip_gen: v7x
topology: tpu7x:2x2x1
jax: 0.10.0
libtpu: 0.0.40
codegen_flags: <defaults>
</compile_context>

<pallas_src>
import jax
import jax.numpy as jnp
from jax.experimental import pallas as pl
from jax.experimental.pallas import tpu as pltpu

BOARD_ROWS = 3
BOARD_COLS = 3
IN_DIM = BOARD_ROWS * BOARD_COLS   # 9
HID = 256
OUT_DIM = BOARD_ROWS * BOARD_COLS  # 9

F_PAD = 128     # lane-dense padded input feature dim
OUT_PAD = 128   # lane-dense padded output dim (unmasked stores)
TILE_B = 256    # batch tile: multiple of 256 (v6e/v7x MXU) and 128 (v5e MXU)


def dqn_kernel(x_ref, w1_ref, w2_ref, w3_ref, b_ref, out_ref):
    # x tile: [TILE_B, F_PAD] f32 (cols >= IN_DIM are zero-padded).
    # Weights are bf16 (MXU-native); accumulate in f32; biases stay f32.
    x = x_ref[...]

    b1 = b_ref[0:1, :]            # [1, HID] f32
    b2 = b_ref[1:2, :]            # [1, HID] f32
    b3 = b_ref[2:3, :OUT_PAD]     # [1, OUT_PAD] f32 (cols >= OUT_DIM are zero)

    h1 = jnp.dot(x.astype(jnp.bfloat16), w1_ref[...],
                 preferred_element_type=jnp.float32) + b1
    h1 = jnp.maximum(h1, 0.0)

    h2 = jnp.dot(h1.astype(jnp.bfloat16), w2_ref[...],
                 preferred_element_type=jnp.float32) + b2
    h2 = jnp.maximum(h2, 0.0)

    out = jnp.dot(h2.astype(jnp.bfloat16), w3_ref[...],
                  preferred_element_type=jnp.float32) + b3
    out_ref[...] = out.astype(out_ref.dtype)


def pack_params(params):
    """Pad/cast params once: bf16 weights in lane-dense padded layout, f32 bias stack."""
    w1p = jnp.zeros((F_PAD, HID), jnp.bfloat16)
    w1p = w1p.at[:IN_DIM, :].set(params["w1"].astype(jnp.bfloat16))
    w2p = params["w2"].astype(jnp.bfloat16)
    w3p = jnp.zeros((HID, OUT_PAD), jnp.bfloat16)
    w3p = w3p.at[:, :OUT_DIM].set(params["w3"].astype(jnp.bfloat16))

    bstack = jnp.zeros((3, HID), jnp.float32)
    bstack = bstack.at[0, :].set(params["b1"][0])
    bstack = bstack.at[1, :].set(params["b2"][0])
    bstack = bstack.at[2, :OUT_DIM].set(params["b3"][0])
    return w1p, w2p, w3p, bstack


def dqn_forward(x, params):
    """x: [B, IN_DIM] float32. params: dict of [in, out] f32 weights + [1, out] f32 biases."""
    B = x.shape[0]
    w1p, w2p, w3p, bstack = pack_params(params)

    # Pad batch to a multiple of TILE_B and features to the lane-dense width.
    B_pad = ((B + TILE_B - 1) // TILE_B) * TILE_B
    xp = jnp.zeros((B_pad, F_PAD), jnp.float32)
    xp = xp.at[:B, :IN_DIM].set(x)

    grid = (B_pad // TILE_B,)
    out_pad = pl.pallas_call(
        dqn_kernel,
        out_shape=jax.ShapeDtypeStruct((B_pad, OUT_PAD), jnp.float32),
        grid=grid,
        in_specs=[
            pl.BlockSpec((TILE_B, F_PAD), lambda i: (i, 0)),   # x: tiled over batch
            pl.BlockSpec((F_PAD, HID), lambda i: (0, 0)),      # w1: VMEM-resident
            pl.BlockSpec((HID, HID), lambda i: (0, 0)),        # w2: VMEM-resident
            pl.BlockSpec((HID, OUT_PAD), lambda i: (0, 0)),    # w3: VMEM-resident
            pl.BlockSpec((3, HID), lambda i: (0, 0)),          # bias stack: resident
        ],
        out_specs=pl.BlockSpec((TILE_B, OUT_PAD), lambda i: (i, 0)),
        compiler_params=pltpu.CompilerParams(
            dimension_semantics=("parallel",)),
    )(xp, w1p, w2p, w3p, bstack)

    return out_pad[:B, :OUT_DIM]


def init_params(key):
    """Deterministic init mimicking PyTorch nn.Linear default (U[-1/sqrt(fan_in), +...]).
    Weights stored as [in, out] (already transposed vs. PyTorch's [out, in])."""
    ks = jax.random.split(key, 6)

    def linear(kw, kb, fan_in, fan_out):
        bound = 1.0 / jnp.sqrt(jnp.float32(fan_in))
        w = jax.random.uniform(kw, (fan_in, fan_out), jnp.float32, -bound, bound)
        b = jax.random.uniform(kb, (1, fan_out), jnp.float32, -bound, bound)
        return w, b

    w1, b1 = linear(ks[0], ks[1], IN_DIM, HID)
    w2, b2 = linear(ks[2], ks[3], HID, HID)
    w3, b3 = linear(ks[4], ks[5], HID, OUT_DIM)
    return {"w1": w1, "b1": b1, "w2": w2, "b2": b2, "w3": w3, "b3": b3}


def dqn_reference(x, params):
    """Pure-JAX reference using the same bf16-quantized weights / f32 biases as the kernel."""
    hp = jax.lax.Precision.HIGHEST
    w1 = params["w1"].astype(jnp.bfloat16).astype(jnp.float32)
    w2 = params["w2"].astype(jnp.bfloat16).astype(jnp.float32)
    w3 = params["w3"].astype(jnp.bfloat16).astype(jnp.float32)
    xb = x.astype(jnp.bfloat16).astype(jnp.float32)
    h1 = jnp.maximum(jnp.dot(xb, w1, precision=hp) + params["b1"], 0.0)
    h1b = h1.astype(jnp.bfloat16).astype(jnp.float32)
    h2 = jnp.maximum(jnp.dot(h1b, w2, precision=hp) + params["b2"], 0.0)
    h2b = h2.astype(jnp.bfloat16).astype(jnp.float32)
    return jnp.dot(h2b, w3, precision=hp) + params["b3"]


if __name__ == "__main__":
    key = jax.random.PRNGKey(0)
    k_param, k_x = jax.random.split(key)

    params = init_params(k_param)

    # Non-multiple-of-TILE_B batch: exercises both padding and a 2-step batch grid.
    B = 300
    # Tic-tac-toe board states flattened: values in {-1, 0, 1}
    x = jax.random.randint(k_x, (B, IN_DIM), -1, 2).astype(jnp.float32)

    out = dqn_forward(x, params)
    out = jax.block_until_ready(out)

    ref = dqn_reference(x, params)
    assert out.shape == (B, OUT_DIM)
    assert jnp.allclose(out, ref, atol=2e-3, rtol=2e-3), float(jnp.max(jnp.abs(out - ref)))

    print("KERNEL_OK")
</pallas_src>

<mosaic_0001>
module attributes {stable_mosaic.version = 11 : i64} {
  func.func @dqn_kernel(%arg0: i32, %arg1: memref<256x128xf32, #tpu.memory_space<vmem>>, %arg2: memref<128x256xbf16, #tpu.memory_space<vmem>>, %arg3: memref<256x256xbf16, #tpu.memory_space<vmem>>, %arg4: memref<256x128xbf16, #tpu.memory_space<vmem>>, %arg5: memref<3x256xf32, #tpu.memory_space<vmem>>, %arg6: memref<256x128xf32, #tpu.memory_space<vmem>>) attributes {dimension_semantics = [#tpu.dimension_semantics<parallel>], iteration_bounds = array<i64: 2>, scalar_prefetch = 0 : i64, scratch_operands = 0 : i64, tpu.core_type = #tpu.core_type<tc>, window_params = [{transform_indices = @transform_0, window_bounds = array<i64: 256, 128>}, {pipeline_mode = #tpu.pipeline_mode<synchronous>, transform_indices = @transform_1, window_bounds = array<i64: 128, 256>}, {pipeline_mode = #tpu.pipeline_mode<synchronous>, transform_indices = @transform_2, window_bounds = array<i64: 256, 256>}, {pipeline_mode = #tpu.pipeline_mode<synchronous>, transform_indices = @transform_3, window_bounds = array<i64: 256, 128>}, {pipeline_mode = #tpu.pipeline_mode<synchronous>, transform_indices = @transform_4, window_bounds = array<i64: 3, 256>}, {transform_indices = @transform_5, window_bounds = array<i64: 256, 128>}]} {
    %c0 = arith.constant 0 : index
    %c0_0 = arith.constant 0 : index
    %0 = vector.load %arg1[%c0, %c0_0] : memref<256x128xf32, #tpu.memory_space<vmem>>, vector<256x128xf32>
    %c0_1 = arith.constant 0 : index
    %c0_2 = arith.constant 0 : index
    %1 = vector.load %arg5[%c0_1, %c0_2] : memref<3x256xf32, #tpu.memory_space<vmem>>, vector<1x256xf32>
    %c1 = arith.constant 1 : index
    %c0_3 = arith.constant 0 : index
    %2 = vector.load %arg5[%c1, %c0_3] : memref<3x256xf32, #tpu.memory_space<vmem>>, vector<1x256xf32>
    %c2 = arith.constant 2 : index
    %c0_4 = arith.constant 0 : index
    %3 = vector.load %arg5[%c2, %c0_4] : memref<3x256xf32, #tpu.memory_space<vmem>>, vector<1x128xf32>
    %4 = arith.truncf %0 : vector<256x128xf32> to vector<256x128xbf16>
    %c0_5 = arith.constant 0 : index
    %c0_6 = arith.constant 0 : index
    %5 = vector.load %arg2[%c0_5, %c0_6] : memref<128x256xbf16, #tpu.memory_space<vmem>>, vector<128x256xbf16>
    %cst = arith.constant dense<0.000000e+00> : vector<256x256xf32>
    %6 = tpu.matmul %4, %5, %cst {dimension_numbers = #tpu.dot_dimension_numbers<[1], [0], [0], [1], [0, 0, 1, 1], [], []>} : vector<256x128xbf16>, vector<128x256xbf16>, vector<256x256xf32> -> vector<256x256xf32>
    %7 = vector.broadcast %1 : vector<1x256xf32> to vector<256x256xf32>
    %8 = arith.addf %6, %7 : vector<256x256xf32>
    %cst_7 = arith.constant 0.000000e+00 : f32
    %9 = vector.broadcast %cst_7 : f32 to vector<256x256xf32>
    %10 = arith.maximumf %8, %9 : vector<256x256xf32>
    %11 = arith.truncf %10 : vector<256x256xf32> to vector<256x256xbf16>
    %c0_8 = arith.constant 0 : index
    %c0_9 = arith.constant 0 : index
    %12 = vector.load %arg3[%c0_8, %c0_9] : memref<256x256xbf16, #tpu.memory_space<vmem>>, vector<256x256xbf16>
    %cst_10 = arith.constant dense<0.000000e+00> : vector<256x256xf32>
    %13 = tpu.matmul %11, %12, %cst_10 {dimension_numbers = #tpu.dot_dimension_numbers<[1], [0], [0], [1], [0, 0, 1, 1], [], []>} : vector<256x256xbf16>, vector<256x256xbf16>, vector<256x256xf32> -> vector<256x256xf32>
    %14 = vector.broadcast %2 : vector<1x256xf32> to vector<256x256xf32>
    %15 = arith.addf %13, %14 : vector<256x256xf32>
    %cst_11 = arith.constant 0.000000e+00 : f32
    %16 = vector.broadcast %cst_11 : f32 to vector<256x256xf32>
    %17 = arith.maximumf %15, %16 : vector<256x256xf32>
    %18 = arith.truncf %17 : vector<256x256xf32> to vector<256x256xbf16>
    %c0_12 = arith.constant 0 : index
    %c0_13 = arith.constant 0 : index
    %19 = vector.load %arg4[%c0_12, %c0_13] : memref<256x128xbf16, #tpu.memory_space<vmem>>, vector<256x128xbf16>
    %cst_14 = arith.constant dense<0.000000e+00> : vector<256x128xf32>
    %20 = tpu.matmul %18, %19, %cst_14 {dimension_numbers = #tpu.dot_dimension_numbers<[1], [0], [0], [1], [0, 0, 1, 1], [], []>} : vector<256x256xbf16>, vector<256x128xbf16>, vector<256x128xf32> -> vector<256x128xf32>
    %21 = vector.broadcast %3 : vector<1x128xf32> to vector<256x128xf32>
    %22 = arith.addf %20, %21 : vector<256x128xf32>
    %c0_15 = arith.constant 0 : index
    %c0_16 = arith.constant 0 : index
    %23 = vector.load %arg6[%c0_15, %c0_16] : memref<256x128xf32, #tpu.memory_space<vmem>>, vector<256x128xf32>
    tpu.vector_store %arg6[%c0_15, %c0_16], %22 {strides = array<i32>} : memref<256x128xf32, #tpu.memory_space<vmem>>, vector<256x128xf32>,
    return
  }
  func.func @transform_0(%arg0: i32) -> (i32, i32) {
    %c0_i32 = arith.constant 0 : i32
    %c0_i32_0 = arith.constant 0 : i32
    return %arg0, %c0_i32 : i32, i32
  }
  func.func @transform_1(%arg0: i32) -> (i32, i32) {
    %c0_i32 = arith.constant 0 : i32
    %c0_i32_0 = arith.constant 0 : i32
    %c0_i32_1 = arith.constant 0 : i32
    return %c0_i32, %c0_i32_0 : i32, i32
  }
  func.func @transform_2(%arg0: i32) -> (i32, i32) {
    %c0_i32 = arith.constant 0 : i32
    %c0_i32_0 = arith.constant 0 : i32
    %c0_i32_1 = arith.constant 0 : i32
    return %c0_i32, %c0_i32_0 : i32, i32
  }
  func.func @transform_3(%arg0: i32) -> (i32, i32) {
    %c0_i32 = arith.constant 0 : i32
    %c0_i32_0 = arith.constant 0 : i32
    %c0_i32_1 = arith.constant 0 : i32
    return %c0_i32, %c0_i32_0 : i32, i32
  }
  func.func @transform_4(%arg0: i32) -> (i32, i32) {
    %c0_i32 = arith.constant 0 : i32
    %c0_i32_0 = arith.constant 0 : i32
    %c0_i32_1 = arith.constant 0 : i32
    return %c0_i32, %c0_i32_0 : i32, i32
  }
  func.func @transform_5(%arg0: i32) -> (i32, i32) {
    %c0_i32 = arith.constant 0 : i32
    %c0_i32_0 = arith.constant 0 : i32
    return %arg0, %c0_i32 : i32, i32
  }
}

</mosaic_0001>

<bundles_post_ra>
// kernel: tpu_custom_call.1
= control target key start
LH: loop header
LB: loop body
LE: loop exit
PB: predicated region body
PF: predicated region fallthrough
CT: control target
= control target key end

     0   :  { %10 = vsyncpa [#allocation3], 0  ;;  %s2875_s0 = inlined_call_operand.hbm [shape: f32[512,128], index: 0, kind: input, shape index: {}]   ;;  %s2876_s1 = inlined_call_operand.hbm [shape: bf16[128,256], index: 1, kind: input, shape index: {}]   ;;  %s2877_s2 = inlined_call_operand.hbm [shape: bf16[256,256], index: 2, kind: input, shape index: {}]   ;;  %s2878_s3 = inlined_call_operand.hbm [shape: bf16[256,128], index: 3, kind: input, shape index: {}]   ;;  %s2879_s4 = inlined_call_operand.vmem [shape: f32[3,256], index: 4, kind: input, shape index: {}]   ;;  %s2880_s5 = inlined_call_operand.hbm [shape: f32[512,128], index: 5, kind: output, shape index: {}]  }
   0x1   :  { %12 = vsyncpa [#allocation3 + $0x1], 0 }
   0x2   :  { %13 = vsyncpa [#allocation6], 0 }
   0x3   :  { %14 = vsyncpa [#allocation9], 0 }
   0x4   :  { %15 = vsyncpa [#allocation4], 0 }
   0x5   :  { %17 = vsyncpa [#allocation4 + $0x1], 0  ;;  %s2291_s18 = smov 0   ;;  %s2293_s19 = smov 0  }
   0x6   :  { %s2295_s20 = smov 0   ;;  %s2297_s21 = smov 0  }
   0x7 LB: > { %s2312_s22 = sadd.s32 4294967295, %s2247_s21   ;;  %s1671_s23 = sadd.s32 4294967294, %s2247_s21   ;;  %s2247_s21 = sphi %s2297_s21, %s2903_s21   ;;  %s2243_s20 = sphi %s2295_s20, %s2902_s20   ;;  %s2239_s19 = sphi %s2293_s19, %s2901_s19   ;;  %s2235_s18 = sphi %s2291_s18, %s2900_s18  }
   0x8   : > { %p43_p0 = scmp.ne.s32.totalorder %s2239_s19, %s2235_s18  ;;  %p2881_p1 = scmp.eq.s32.totalorder %s2312_s22, 0 }
   0x9   : > { %p157_p3 = scmp.eq.s32.totalorder %s1671_s23, 1  ;;  %p1672_p5 = scmp.ge.s32.totalorder %s2247_s21, 1 }
   0xa   : > { %p2321_p4 = por %p2881_p1, %p43_p0  ;;  %p164_p7 = scmp.lt.s32.totalorder %s2247_s21, 3 }
   0xb   : > { %p2326_p6 = por %p157_p3, %p43_p0  ;;  %s2249_s27 = smov [#allocation5]  }
   0xc   : > { %s2884_s24 = scalar_select %p2321_p4, 1, 0 }
   0xd   : > { %s2885_s25 = scalar_select %p2326_p6, 1, 0 }
   0xe   : > { %p2331_p8 = pnand %p1672_p5, %p164_p7  ;;  %s176_s28 = sshll.u32 %s2249_s27, 4  ;;  %s2335_s28 = int_to_ptr.vmem [resolvable:$true] %s176_s28 }
   0xf   : > { %s2250_s30 = smov [#allocation7]   ;;  %s2251_s7 = smov [#allocation8]  }
  0x10   : > { %s2886_s26 = scalar_select %p2331_p8, 1, 0 }
  0x11   : > { %p1903_p9 = pneg %p2331_p8  ;;  %s189_s6 = sshll.u32 %s2250_s30, 4  ;;  %s2346_s6 = int_to_ptr.vmem [resolvable:$true] %s189_s6 }
  0x12   : > { %s2348_s8 = sshll.u32 %s2251_s7, 4  ;;  %s2059_s11 = scalar_lea.hbm %s2876_s1, 2048  ;;  %s203_s8 = int_to_ptr.vmem [resolvable:$true] %s2348_s8 }
  0x13   : > { %p2342_p11 = pnand %p1903_p9, %p2881_p1  ;;  %p2060_p12 = scmp.ne.s32.totalorder %s2876_s1, %s2059_s11 }
  0x14   : > { %p2066_p5 = scmp.lt.u32.totalorder %s2059_s11, %s2876_s1 }
  0x15   : > { %p2358_p13 = pneg %p2342_p11 }
  0x17   : > { %p2062_p0 = pnand %p2358_p13, %p2060_p12 }
  0x19   : > { %p2063_p3 = pneg %p2062_p0 }
  0x1b   : > { %p2068_p7 = pnand %p2066_p5, %p2063_p3 }
  0x1d   : > { %2071 = shalt.err (!%p2068_p7)
}
  0x1e   : > { %s2072_s17 = scalar_lea.vmem %s2335_s28, 2048  ;;  %p2080_p2 = scmp.lt.s32.totalorder %s2335_s28, %s2335_s28 }
  0x1f   : > { %p2073_p9 = scmp.ne.s32.totalorder %s2335_s28, %s2072_s17  ;;  %p2081_p6 = scmp.lt.s32.totalorder %s2072_s17, %s2072_s17 }
  0x21   : > { %p2075_p10 = pnand %p2073_p9, %p2358_p13  ;;  %p2082_p12 = por %p2081_p6, %p2080_p2 }
  0x23   : > { %p2076_p1 = pneg %p2075_p10 }
  0x25   : > { %p2083_p0 = pnand %p2082_p12, %p2076_p1 }
  0x27   : > { %2086 = shalt.err (!%p2083_p0)
}
  0x28   : > { %s2252_s23 = smov 128   ;;  %s2253_s27 = smov 8  }
  0x29   : > { %1906 = dma.hbm_to_vmem [thread:$0]  (!%p2342_p11), %s2876_s1, 2048, %s2335_s28, [#allocation6], %s2252_s23, %s2252_s23, %s2253_s27  }
  0x2a   : > { %s2087_s11 = scalar_lea.hbm %s2877_s2, 4096 }
  0x2b   : > { %p2088_p1 = scmp.ne.s32.totalorder %s2877_s2, %s2087_s11  ;;  %p2094_p10 = scmp.lt.u32.totalorder %s2087_s11, %s2877_s2 }
  0x2d   : > { %p2090_p2 = pnand %p2088_p1, %p2358_p13 }
  0x2f   : > { %p2091_p6 = pneg %p2090_p2 }
  0x31   : > { %p2096_p3 = pnand %p2094_p10, %p2091_p6 }
  0x33   : > { %2099 = shalt.err (!%p2096_p3)
}
  0x34   : > { %s2100_s28 = scalar_lea.vmem %s2346_s6, 4096  ;;  %p2108_p12 = scmp.lt.s32.totalorder %s2346_s6, %s2346_s6 }
  0x35   : > { %p2101_p5 = scmp.ne.s32.totalorder %s2346_s6, %s2100_s28  ;;  %p2109_p0 = scmp.lt.s32.totalorder %s2100_s28, %s2100_s28 }
  0x37   : > { %p2103_p7 = pnand %p2101_p5, %p2358_p13  ;;  %p2110_p1 = por %p2109_p0, %p2108_p12 }
  0x39   : > { %p2104_p9 = pneg %p2103_p7 }
  0x3b   : > { %p2111_p2 = pnand %p2110_p1, %p2104_p9 }
  0x3d   : > { %2114 = shalt.err (!%p2111_p2)
}
  0x3e   : > { %1909 = dma.hbm_to_vmem [thread:$0]  (!%p2342_p11), %s2877_s2, 4096, %s2346_s6, [#allocation6], %s2252_s23, %s2252_s23, %s2253_s27  }
  0x3f   : > { %s2115_s10 = scalar_lea.hbm %s2878_s3, 2048 }
  0x40   : > { %p2116_p6 = scmp.ne.s32.totalorder %s2878_s3, %s2115_s10  ;;  %p2122_p5 = scmp.lt.u32.totalorder %s2115_s10, %s2878_s3 }
  0x42   : > { %p2118_p10 = pnand %p2116_p6, %p2358_p13 }
  0x44   : > { %p2119_p3 = pneg %p2118_p10 }
  0x46   : > { %p2124_p7 = pnand %p2122_p5, %p2119_p3 }
  0x48   : > { %2127 = shalt.err (!%p2124_p7)
}
  0x49   : > { %s2128_s16 = scalar_lea.vmem %s203_s8, 2048  ;;  %p2136_p1 = scmp.lt.s32.totalorder %s203_s8, %s203_s8 }
  0x4a   : > { %p2129_p9 = scmp.ne.s32.totalorder %s203_s8, %s2128_s16  ;;  %p2137_p2 = scmp.lt.s32.totalorder %s2128_s16, %s2128_s16 }
  0x4c   : > { %p2131_p12 = pnand %p2129_p9, %p2358_p13  ;;  %p2138_p4 = por %p2137_p2, %p2136_p1 }
  0x4e   : > { %p2132_p0 = pneg %p2131_p12 }
  0x50   : > { %p2139_p8 = pnand %p2138_p4, %p2132_p0 }
  0x52   : > { %2142 = shalt.err (!%p2139_p8)
}
  0x53   : > { %s2254_s6 = smov 64   ;;  %s2255_s14 = smov 4  }
  0x54   : > { %1912 = dma.hbm_to_vmem [thread:$0]  (!%p2342_p11), %s2878_s3, 2048, %s203_s8, [#allocation9], %s2254_s6, %s2254_s6, %s2255_s14  }
  0x55   : > { %s2428_s30 = sadd.s32 1, %s2247_s21   ;;  %s30_s9 = sadd.s32 1, %s2243_s20 }
  0x56   : > { %s27_s7 = ssub.s32 %s2247_s21, %s2428_s30  ;;  %p37_p8 = scmp.ne.s32.totalorder %s2243_s20, %s2239_s19 }
  0x57   : > { %p28_p4 = scmp.eq.s32.totalorder %s27_s7, 0  ;;  %p38_p13 = scmp.eq.s32.totalorder %s2247_s21, 0 }
  0x58   : > { %p1924_p6 = scmp.lt.s32.totalorder %s2247_s21, 2  ;;  %p2889_p3 = scmp.eq.s32.totalorder %s2312_s22, 1 }
  0x59   : > { %s2438_s10 = scalar_select %p28_p4, %s2243_s20, %s30_s9  }
  0x5a   : > { %p39_p10 = por %p38_p13, %p37_p8  ;;  %p2442_p5 = por %p2889_p3, %p37_p8 }
  0x5b   : > { %s219_s29 = sand.u32 1, %s2243_s20   ;;  %s1757_s12 = sshll.u32 %s2247_s21, 12 }
  0x5c   : > { %s1677_s8 = sshll.u32 %s219_s29, 8  ;;  %s2451_s16 = scalar_lea.hbm %s2875_s0, %s1757_s12 }
  0x5d   : > { %s223_s6 = scalar_lea.vmem [#allocation2], %s1677_s8  ;;  %p2453_p11 = pnand %p1924_p6, %p39_p10 }
  0x5e   : > { %s230_s14 = sshll.u32 %s223_s6, 4  ;;  %s2459_s17 = scalar_lea.sflag [#allocation3], %s219_s29  ;;  %s2457_s14 = int_to_ptr.vmem [resolvable:$true] %s230_s14 }
  0x5f   : > { %s2143_s7 = scalar_lea.hbm %s2451_s16, 4096  ;;  %p2145_p9 = pneg %p2453_p11 }
  0x60   : > { %p2144_p7 = scmp.ne.s32.totalorder %s2451_s16, %s2143_s7  ;;  %s2148_s8 = scalar_lea.hbm %s2875_s0, 8192 }
  0x61   : > { %p2149_p1 = scmp.lt.u32.totalorder %s2451_s16, %s2875_s0  ;;  %p2150_p2 = scmp.lt.u32.totalorder %s2148_s8, %s2143_s7 }
  0x62   : > { %p2146_p12 = pnand %p2145_p9, %p2144_p7  ;;  %p2152_p8 = scmp.lt.u32.totalorder %s2143_s7, %s2451_s16 }
  0x63   : > { %p2151_p4 = por %p2150_p2, %p2149_p1 }
  0x64   : > { %p2147_p0 = pneg %p2146_p12 }
  0x65   : > { %p2153_p13 = por %p2152_p8, %p2151_p4 }
  0x67   : > { %p2154_p6 = pnand %p2153_p13, %p2147_p0 }
  0x69   : > { %2157 = shalt.err (!%p2154_p6)
}
  0x6a   : > { %s2158_s29 = scalar_lea.vmem %s2457_s14, 4096  ;;  %s2256_s6 = smov [#allocation2]  }
  0x6b   : > { %p2159_p10 = scmp.ne.s32.totalorder %s2457_s14, %s2158_s29  ;;  %s2163_s9 = sshll.u32 %s2256_s6, 4  ;;  %s2164_s9 = int_to_ptr.vmem [resolvable:$false] %s2163_s9 }
  0x6c   : > { %s2165_s12 = scalar_lea.vmem %s2164_s9, 8192  ;;  %p2166_p12 = scmp.lt.s32.totalorder %s2457_s14, %s2164_s9 }
  0x6d   : > { %p2161_p3 = pnand %p2159_p10, %p2145_p9  ;;  %p2167_p1 = scmp.lt.s32.totalorder %s2165_s12, %s2158_s29 }
  0x6f   : > { %p2162_p7 = pneg %p2161_p3  ;;  %p2168_p2 = por %p2167_p1, %p2166_p12 }
  0x71   : > { %p2169_p4 = pnand %p2168_p2, %p2162_p7 }
  0x73   : > { %2172 = shalt.err (!%p2169_p4)
}
  0x74   : > { %1916 = dma.hbm_to_vmem [thread:$0]  (!%p2453_p11), %s2451_s16, 4096, %s2457_s14, %s2459_s17, %s2252_s23, %s2252_s23, %s2253_s27  }
  0x75   : > { %p2892_p9 = scmp.ne.s32.totalorder %s2886_s26, 0 }
  0x76   : > { %s2493_s7 = sand.u32 (!%p2892_p9), 1, %s2239_s19   ;;  %p2893_p0 = scmp.ne.s32.totalorder (!%p2892_p9), %s2884_s24, 0 }
  0x77   : > { %242 = sbr.rel (%p2892_p9) target bundleno = 966 (0x3c6), region = 40  ;;  %s1681_s8 = sshll.u32 (!%p2892_p9), %s2493_s7, 8 }
  0x78   : > { %s245_s13 = scalar_lea.sflag (!%p2892_p9), [#allocation3], %s2493_s7  ;;  %s2499_s28 = scalar_lea.vmem (!%p2892_p9), [#allocation2], %s1681_s8 }
  0x7e   : > { %2218 = dma.done.wait (%p2893_p0), %s245_s13, 4096  }
  0x7f   : > { %2220 = vsyncadd (%p2893_p0), %s245_s13, 4294963200  ;;  %p2894_p11 = scmp.eq.s32.totalorder %s2312_s22, 0 }
  0x81   : > { %2222 = dma.done.wait (%p2894_p11), [#allocation6], 6144   ;;  %p2895_p8 = pmov %p2894_p11 }
  0x83   : > { %2224 = vsyncadd (%p2895_p8), [#allocation6], 4294961152  ;;  %p2896_p13 = pmov %p2895_p8 }
  0x84   : > { %p2897_p6 = pmov %p2895_p8 }
  0x85   : > { %2226 = dma.done.wait (%p2896_p13), [#allocation9], 2048  }
  0x86   : > { %2228 = vsyncadd (%p2897_p6), [#allocation9], 4294965248  ;;  %v2257_v0 = vmov 0   ;;  %v1971_v1 = vld [vmem:[#allocation5 + $0x4] ss:$8 sps:$4 sm:$0xff]   ;;  %v292_v26 = vld [vmem:[%s2499_s28 + $0x10] sm:$0xff] }
  0x87   : > { %481 = vmatprep.mubr.bf16.mxu0 %v2257_v0  ;;  %561 = vmatprep.mubr.bf16.mxu1 %v2257_v0  ;;  %v1973_v2 = vld [vmem:[#allocation5] ss:$8 sps:$4 sm:$0xff]   ;;  %v1974_v3 = vld [vmem:[#allocation5 + $0x14] ss:$8 sps:$4 sm:$0xff]   ;;  %v1976_v4 = vld [vmem:[#allocation5 + $0x10] ss:$8 sps:$4 sm:$0xff]  }
  0x88   : > { %449 = vmatprep.subr.bf16.mxu0 %v1971_v1  ;;  %1871 = vmatprep.subr.bf16.mxu1 %v1971_v1  ;;  %v1977_v5 = vld [vmem:[#allocation5 + $0x24] ss:$8 sps:$4 sm:$0xff]   ;;  %v1979_v6 = vld [vmem:[#allocation5 + $0x20] ss:$8 sps:$4 sm:$0xff]   ;;  %v1980_v7 = vld [vmem:[#allocation5 + $0x34] ss:$8 sps:$4 sm:$0xff]  }
  0x89   : > { %450 = vmatpush1.bf16.msra.mxu0 %v1973_v2  ;;  %1879 = vmatpush1.bf16.msra.mxu1 %v1973_v2  ;;  %v1982_v8 = vld [vmem:[#allocation5 + $0x30] ss:$8 sps:$4 sm:$0xff]   ;;  %v1983_v9 = vld [vmem:[#allocation5 + $0x44] ss:$8 sps:$4 sm:$0xff]   ;;  %v1985_v10 = vld [vmem:[#allocation5 + $0x40] ss:$8 sps:$4 sm:$0xff]  }
  0x8a   : > { %451 = vmatprep.subr.bf16.mxu0 %v1974_v3  ;;  %1872 = vmatprep.subr.bf16.mxu1 %v1974_v3  ;;  %v1986_v11 = vld [vmem:[#allocation5 + $0x54] ss:$8 sps:$4 sm:$0xff]   ;;  %v1988_v12 = vld [vmem:[#allocation5 + $0x50] ss:$8 sps:$4 sm:$0xff]   ;;  %v1989_v13 = vld [vmem:[#allocation5 + $0x64] ss:$8 sps:$4 sm:$0xff]  }
  0x8b   : > { %v1991_v14 = vld [vmem:[#allocation5 + $0x60] ss:$8 sps:$4 sm:$0xff]   ;;  %v1992_v15 = vld [vmem:[#allocation5 + $0x74] ss:$8 sps:$4 sm:$0xff]   ;;  %v1994_v16 = vld [vmem:[#allocation5 + $0x70] ss:$8 sps:$4 sm:$0xff]  }
  0x8c   : > { %v290_v17 = vld [vmem:[%s2499_s28] sm:$0xff]  ;;  %v291_v18 = vld [vmem:[%s2499_s28 + $0x8] sm:$0xff]  ;;  %v2000_v25 = vld [vmem:[#allocation7 + $0x14] ss:$8 sps:$4 sm:$0xff]   ;;  %s2759_s17 = scalar_lea.vmem [#allocation10], %s1681_s8  ;;  %s1758_s15 = sshll.u32 %s2312_s22, 12 }
  0x8d   : > { %452 = vmatpush1.bf16.msra.mxu0 %v1976_v4  ;;  %1880 = vmatpush1.bf16.msra.mxu1 %v1976_v4  ;;  %v306_v19 = vld [vmem:[%s2499_s28 + $0x80] sm:$0xff]  ;;  %v307_v20 = vld [vmem:[%s2499_s28 + $0x88] sm:$0xff]  ;;  %v326_v22 = vpack.c.bf16 %v291_v18, %v290_v17  ;;  %v293_v27 = vld [vmem:[%s2499_s28 + $0x18] sm:$0xff]  ;;  %s1569_s29 = sshll.u32 %s2759_s17, 4  ;;  %s2826_s12 = scalar_lea.hbm %s2880_s5, %s1758_s15  ;;  %s2828_s29 = int_to_ptr.vmem [resolvable:$true] %s1569_s29 }
  0x8e   : > { %453 = vmatprep.subr.bf16.mxu0 %v1977_v5  ;;  %1873 = vmatprep.subr.bf16.mxu1 %v1977_v5  ;;  %v1997_v21 = vld [vmem:[#allocation7 + $0x4] ss:$8 sps:$4 sm:$0xff]   ;;  %v334_v23 = vpack.c.bf16 %v307_v20, %v306_v19  ;;  %v1995_v24 = vld [vmem:[#allocation7] ss:$8 sps:$4 sm:$0xff]   ;;  %v308_v28 = vld [vmem:[%s2499_s28 + $0x90] sm:$0xff]  ;;  %v327_v32 = vpack.c.bf16 %v293_v27, %v292_v26  ;;  %s1556_s22 = scalar_lea.sflag [#allocation4], %s2493_s7 }
  0x8f   : > { %v309_v29 = vld [vmem:[%s2499_s28 + $0x98] sm:$0xff]  ;;  %v2003_v31 = vld [vmem:[#allocation7 + $0x24] ss:$8 sps:$4 sm:$0xff]   ;;  %v2001_v34 = vld [vmem:[#allocation7 + $0x20] ss:$8 sps:$4 sm:$0xff]   ;;  %s2173_s8 = scalar_lea.vmem %s2828_s29, 4096 }
  0x90   : > { %v1998_v30 = vld [vmem:[#allocation7 + $0x10] ss:$8 sps:$4 sm:$0xff]   ;;  %v335_v33 = vpack.c.bf16 %v309_v29, %v308_v28  ;;  %v2006_v35 = vld [vmem:[#allocation7 + $0x34] ss:$8 sps:$4 sm:$0xff]   ;;  %v294_v36 = vld [vmem:[%s2499_s28 + $0x20] sm:$0xff]  ;;  %p2174_p10 = scmp.ne.s32.totalorder %s2828_s29, %s2173_s8  ;;  %s2258_s13 = smov [#allocation10]  }
  0x91   : > { %454 = vmatpush1.bf16.msra.mxu0 %v1979_v6  ;;  %1881 = vmatpush1.bf16.msra.mxu1 %v1979_v6  ;;  %v295_v37 = vld [vmem:[%s2499_s28 + $0x28] sm:$0xff]  ;;  %v310_v38 = vld [vmem:[%s2499_s28 + $0xa0] sm:$0xff]  ;;  %v2004_v40 = vld [vmem:[#allocation7 + $0x30] ss:$8 sps:$4 sm:$0xff]  }
  0x92   : > { %455 = vmatprep.subr.bf16.mxu0 %v1980_v7  ;;  %1874 = vmatprep.subr.bf16.mxu1 %v1980_v7  ;;  %v311_v39 = vld [vmem:[%s2499_s28 + $0xa8] sm:$0xff]  ;;  %v328_v42 = vpack.c.bf16 %v295_v37, %v294_v36  ;;  %v2012_v45 = vld [vmem:[#allocation7 + $0x54] ss:$8 sps:$4 sm:$0xff]   ;;  %v2010_v50 = vld [vmem:[#allocation7 + $0x50] ss:$8 sps:$4 sm:$0xff]   ;;  %p2175_p3 = pnand %p2174_p10, %p2442_p5 }
  0x93   : > { %v2009_v41 = vld [vmem:[#allocation7 + $0x44] ss:$8 sps:$4 sm:$0xff]   ;;  %v336_v43 = vpack.c.bf16 %v311_v39, %v310_v38  ;;  %v2007_v44 = vld [vmem:[#allocation7 + $0x40] ss:$8 sps:$4 sm:$0xff]   ;;  %v296_v46 = vld [vmem:[%s2499_s28 + $0x30] sm:$0xff] }
  0x94   : > { %v297_v47 = vld [vmem:[%s2499_s28 + $0x38] sm:$0xff]  ;;  %v312_v48 = vld [vmem:[%s2499_s28 + $0xb0] sm:$0xff]  ;;  %v2015_v51 = vld [vmem:[#allocation7 + $0x64] ss:$8 sps:$4 sm:$0xff]   ;;  %p2176_p7 = pneg %p2175_p3 }
  0x95   : > { %456 = vmatpush1.bf16.msra.mxu0 %v1982_v8  ;;  %1882 = vmatpush1.bf16.msra.mxu1 %v1982_v8  ;;  %v313_v49 = vld [vmem:[%s2499_s28 + $0xb8] sm:$0xff]  ;;  %v329_v52 = vpack.c.bf16 %v297_v47, %v296_v46  ;;  %v2013_v54 = vld [vmem:[#allocation7 + $0x60] ss:$8 sps:$4 sm:$0xff]   ;;  %v2021_v61 = vld [vmem:[#allocation7 + $0x84] ss:$8 sps:$4 sm:$0xff]  }
  0x96   : > { %457 = vmatprep.subr.bf16.mxu0 %v1983_v9  ;;  %1875 = vmatprep.subr.bf16.mxu1 %v1983_v9  ;;  %v337_v53 = vpack.c.bf16 %v313_v49, %v312_v48  ;;  %v2018_v55 = vld [vmem:[#allocation7 + $0x74] ss:$8 sps:$4 sm:$0xff]   ;;  %v298_v56 = vld [vmem:[%s2499_s28 + $0x40] sm:$0xff]  ;;  %v299_v57 = vld [vmem:[%s2499_s28 + $0x48] sm:$0xff] }
  0x97   : > { %v314_v58 = vld [vmem:[%s2499_s28 + $0xc0] sm:$0xff]  ;;  %v315_v59 = vld [vmem:[%s2499_s28 + $0xc8] sm:$0xff]  ;;  %v2016_v60 = vld [vmem:[#allocation7 + $0x70] ss:$8 sps:$4 sm:$0xff]   ;;  %v330_v62 = vpack.c.bf16 %v299_v57, %v298_v56 }
  0x98   : > { %v338_v63 = vpack.c.bf16 %v315_v59, %v314_v58  ;;  %v2019_v1 = vld [vmem:[#allocation7 + $0x80] ss:$8 sps:$4 sm:$0xff]   ;;  %v2024_v2 = vld [vmem:[#allocation7 + $0x94] ss:$8 sps:$4 sm:$0xff]   ;;  %v2022_v7 = vld [vmem:[#allocation7 + $0x90] ss:$8 sps:$4 sm:$0xff]  }
  0x99   : > { %458 = vmatpush1.bf16.msra.mxu0 %v1985_v10  ;;  %1883 = vmatpush1.bf16.msra.mxu1 %v1985_v10  ;;  %v300_v3 = vld [vmem:[%s2499_s28 + $0x50] sm:$0xff]  ;;  %v301_v4 = vld [vmem:[%s2499_s28 + $0x58] sm:$0xff]  ;;  %v2027_v8 = vld [vmem:[#allocation7 + $0xa4] ss:$8 sps:$4 sm:$0xff]  }
  0x9a   : > { %459 = vmatprep.subr.bf16.mxu0 %v1986_v11  ;;  %1876 = vmatprep.subr.bf16.mxu1 %v1986_v11  ;;  %v316_v5 = vld [vmem:[%s2499_s28 + $0xd0] sm:$0xff]  ;;  %v317_v6 = vld [vmem:[%s2499_s28 + $0xd8] sm:$0xff]  ;;  %v331_v9 = vpack.c.bf16 %v301_v4, %v300_v3  ;;  %v2025_v11 = vld [vmem:[#allocation7 + $0xa0] ss:$8 sps:$4 sm:$0xff]  }
  0x9b   : > { %v339_v10 = vpack.c.bf16 %v317_v6, %v316_v5  ;;  %v2028_v17 = vld [vmem:[#allocation7 + $0xb0] ss:$8 sps:$4 sm:$0xff]   ;;  %v2033_v18 = vld [vmem:[#allocation7 + $0xc4] ss:$8 sps:$4 sm:$0xff]  }
  0x9c   : > { %v321_v26 = vld [vmem:[%s2499_s28 + $0xf8] sm:$0xff]  ;;  %v322_v36 = vld [vmem:[%s2879_s4] ss:$4 sm:$0x3]  ;;  %v2046_v4 = vld [vmem:[#allocation8 + $0x8] sm:$0xff]  }
  0x9d   : > { %460 = vmatpush1.bf16.msra.mxu0 %v1988_v12  ;;  %1884 = vmatpush1.bf16.msra.mxu1 %v1988_v12  ;;  %v2030_v12 = vld [vmem:[#allocation7 + $0xb4] ss:$8 sps:$4 sm:$0xff]   ;;  %v2034_v27 = vld [vmem:[#allocation7 + $0xd0] ss:$8 sps:$4 sm:$0xff]   ;;  %v2044_v56 = vld [vmem:[#allocation8] sm:$0xff]  }
  0x9e   : > { %461 = vmatprep.subr.bf16.mxu0 %v1989_v13  ;;  %1877 = vmatprep.subr.bf16.mxu1 %v1989_v13  ;;  %v302_v13 = vld [vmem:[%s2499_s28 + $0x60] sm:$0xff] }
  0xa1   : > { %462 = vmatpush1.bf16.msra.mxu0 %v1991_v14  ;;  %1885 = vmatpush1.bf16.msra.mxu1 %v1991_v14  ;;  %v303_v14 = vld [vmem:[%s2499_s28 + $0x68] sm:$0xff] }
  0xa2   : > { %463 = vmatprep.subr.bf16.mxu0 %v1992_v15  ;;  %1878 = vmatprep.subr.bf16.mxu1 %v1992_v15  ;;  %v318_v15 = vld [vmem:[%s2499_s28 + $0xe0] sm:$0xff]  ;;  %v332_v19 = vpack.c.bf16 %v303_v14, %v302_v13 }
  0xa5   : > { %464 = vmatpush1.bf16.msra.mxu0 %v1994_v16  ;;  %1886 = vmatpush1.bf16.msra.mxu1 %v1994_v16  ;;  %v319_v16 = vld [vmem:[%s2499_s28 + $0xe8] sm:$0xff] }
  0xa6   : > { %941 = vmatprep.subr.bf16.mxu1 %v1997_v21  ;;  %v340_v20 = vpack.c.bf16 %v319_v16, %v318_v15  ;;  %v2031_v21 = vld [vmem:[#allocation7 + $0xc0] ss:$8 sps:$4 sm:$0xff]  }
  0xa8   : > { %482 = vmatmul.mubr.bf16.vlgmr.msra.gmra.mrb[0].mxu0 %v326_v22  ;;  %562 = vmatmul.mubr.bf16.vlgmr.msra.gmra.mrb[0].mxu1 %v334_v23  ;;  %v2036_v22 = vld [vmem:[#allocation7 + $0xd4] ss:$8 sps:$4 sm:$0xff]  }
  0xa9   : > { %491 = vmatprep.mubr.bf16.mxu0 %v2257_v0  ;;  %571 = vmatprep.mubr.bf16.mxu1 %v2257_v0  ;;  %v304_v23 = vld [vmem:[%s2499_s28 + $0x70] sm:$0xff] }
  0xaa   : > { %942 = vmatpush1.bf16.msra.mxu1 %v1995_v24  ;;  %v305_v24 = vld [vmem:[%s2499_s28 + $0x78] sm:$0xff] }
  0xab   : > { %943 = vmatprep.subr.bf16.mxu1 %v2000_v25  ;;  %v320_v25 = vld [vmem:[%s2499_s28 + $0xf0] sm:$0xff]  ;;  %v333_v28 = vpack.c.bf16 %v305_v24, %v304_v23  ;;  %s2177_s28 = sshll.u32 %s2258_s13, 4  ;;  %s2178_s28 = int_to_ptr.vmem [resolvable:$false] %s2177_s28 }
  0xac   : > { %v341_v29 = vpack.c.bf16 %v321_v26, %v320_v25  ;;  %v2049_v26 = vld [vmem:[#allocation8 + $0x58] sm:$0xff]   ;;  %s2179_s24 = scalar_lea.vmem %s2178_s28, 8192  ;;  %p2180_p12 = scmp.lt.s32.totalorder %s2828_s29, %s2178_s28 }
  0xad   : > { %p2181_p1 = scmp.lt.s32.totalorder %s2179_s24, %s2173_s8 }
  0xae   : > { %944 = vmatpush1.bf16.msra.mxu1 %v1998_v30  ;;  %v2039_v30 = vld [vmem:[#allocation7 + $0xe4] ss:$8 sps:$4 sm:$0xff]  }
  0xaf   : > { %945 = vmatprep.subr.bf16.mxu1 %v2003_v31  ;;  %v2037_v31 = vld [vmem:[#allocation7 + $0xe0] ss:$8 sps:$4 sm:$0xff]   ;;  %p2182_p2 = por %p2181_p1, %p2180_p12 }
  0xb0   : > { %492 = vmatmul.mubr.bf16.gmra.mrb[4].mxu0 %v327_v32  ;;  %572 = vmatmul.mubr.bf16.gmra.mrb[4].mxu1 %v335_v33  ;;  %v2042_v32 = vld [vmem:[#allocation7 + $0xf4] ss:$8 sps:$4 sm:$0xff]   ;;  %v2040_v33 = vld [vmem:[#allocation7 + $0xf0] ss:$8 sps:$4 sm:$0xff]  }
  0xb1   : > { %501 = vmatprep.mubr.bf16.mxu0 %v2257_v0  ;;  %581 = vmatprep.mubr.bf16.mxu1 %v2257_v0  ;;  %p2183_p4 = pnand %p2182_p2, %p2176_p7 }
  0xb2   : > { %946 = vmatpush1.bf16.msra.mxu1 %v2001_v34  ;;  %v359_v34 = vlaneseq }
  0xb3   : > { %947 = vmatprep.subr.bf16.mxu1 %v2006_v35 }
  0xb6   : > { %948 = vmatpush1.bf16.msra.mxu1 %v2004_v40 }
  0xb7   : > { %949 = vmatprep.subr.bf16.mxu1 %v2009_v41 }
  0xb8   : > { %502 = vmatmul.mubr.bf16.gmra.mrb[8].mxu0 %v328_v42  ;;  %582 = vmatmul.mubr.bf16.gmra.mrb[8].mxu1 %v336_v43 }
  0xb9   : > { %511 = vmatprep.mubr.bf16.mxu0 %v2257_v0  ;;  %591 = vmatprep.mubr.bf16.mxu1 %v2257_v0 }
  0xba   : > { %950 = vmatpush1.bf16.msra.mxu1 %v2007_v44 }
  0xbb   : > { %951 = vmatprep.subr.bf16.mxu1 %v2012_v45 }
  0xbe   : > { %952 = vmatpush1.bf16.msra.mxu1 %v2010_v50 }
  0xbf   : > { %953 = vmatprep.subr.bf16.mxu1 %v2015_v51 }
  0xc0   : > { %512 = vmatmul.mubr.bf16.gmra.mrb[12].mxu0 %v329_v52  ;;  %592 = vmatmul.mubr.bf16.gmra.mrb[12].mxu1 %v337_v53 }
  0xc1   : > { %521 = vmatprep.mubr.bf16.mxu0 %v2257_v0  ;;  %601 = vmatprep.mubr.bf16.mxu1 %v2257_v0 }
  0xc2   : > { %954 = vmatpush1.bf16.msra.mxu1 %v2013_v54 }
  0xc3   : > { %955 = vmatprep.subr.bf16.mxu1 %v2018_v55  ;;  %v2043_v55 = vld [vmem:[#allocation8 + $0x40] sm:$0xff]  }
  0xc4   : > { %1759 = vmatprep.subr.bf16.mxu0 %v2043_v55 }
  0xc5   : > { %1760 = vmatpush3.bf16.msra.mxu0 %v2044_v56  ;;  %v2052_v56 = vld [vmem:[#allocation8 + $0x20] sm:$0xff]  }
  0xc6   : > { %956 = vmatpush1.bf16.msra.mxu1 %v2016_v60  ;;  %v2045_v60 = vld [vmem:[#allocation8 + $0x48] sm:$0xff]  }
  0xc7   : > { %957 = vmatprep.subr.bf16.mxu1 %v2021_v61  ;;  %1761 = vmatprep.subr.bf16.mxu0 %v2045_v60 }
  0xc8   : > { %522 = vmatmul.mubr.bf16.gmra.mrb[16].mxu0 %v330_v62  ;;  %602 = vmatmul.mubr.bf16.gmra.mrb[16].mxu1 %v338_v63 }
  0xc9   : > { %531 = vmatprep.mubr.bf16.mxu0 %v2257_v0  ;;  %611 = vmatprep.mubr.bf16.mxu1 %v2257_v0 }
  0xca   : > { %958 = vmatpush1.bf16.msra.mxu1 %v2019_v1  ;;  %1762 = vmatpush3.bf16.msra.mxu0 %v2046_v4 }
  0xcb   : > { %959 = vmatprep.subr.bf16.mxu1 %v2024_v2 }
  0xce   : > { %960 = vmatpush1.bf16.msra.mxu1 %v2022_v7  ;;  %v2047_v7 = vld [vmem:[#allocation8 + $0x50] sm:$0xff]  }
  0xcf   : > { %961 = vmatprep.subr.bf16.mxu1 %v2027_v8  ;;  %1763 = vmatprep.subr.bf16.mxu0 %v2047_v7 }
  0xd0   : > { %532 = vmatmul.mubr.bf16.gmra.mrb[20].mxu0 %v331_v9  ;;  %612 = vmatmul.mubr.bf16.gmra.mrb[20].mxu1 %v339_v10 }
  0xd1   : > { %541 = vmatprep.mubr.bf16.mxu0 %v2257_v0  ;;  %621 = vmatprep.mubr.bf16.mxu1 %v2257_v0 }
  0xd2   : > { %962 = vmatpush1.bf16.msra.mxu1 %v2025_v11 }
  0xd3   : > { %963 = vmatprep.subr.bf16.mxu1 %v2030_v12 }
  0xd6   : > { %964 = vmatpush1.bf16.msra.mxu1 %v2028_v17 }
  0xd7   : > { %965 = vmatprep.subr.bf16.mxu1 %v2033_v18 }
  0xd8   : > { %542 = vmatmul.mubr.bf16.gmra.mrb[24].mxu0 %v332_v19  ;;  %622 = vmatmul.mubr.bf16.gmra.mrb[24].mxu1 %v340_v20  ;;  %v2048_v20 = vld [vmem:[#allocation8 + $0x10] sm:$0xff]  }
  0xd9   : > { %551 = vmatprep.mubr.bf16.mxu0 %v2257_v0  ;;  %631 = vmatprep.mubr.bf16.mxu1 %v2257_v0  ;;  %v2561_v0 = vshrl.u32 %v359_v34, 7 }
  0xda   : > { %966 = vmatpush1.bf16.msra.mxu1 %v2031_v21  ;;  %1764 = vmatpush3.bf16.msra.mxu0 %v2048_v20 }
  0xdb   : > { %967 = vmatprep.subr.bf16.mxu1 %v2036_v22  ;;  %v361_v35 = vsub.s32 0, %v2561_v0  ;;  %v365_v37 = vsub.s32 1, %v2561_v0  ;;  %1765 = vmatprep.subr.bf16.mxu0 %v2049_v26 }
  0xdd   : > { %v2570_v38 = vrot.slane %v322_v36, %v361_v35  ;;  %v2574_v39 = vrot.slane %v322_v36, %v365_v37 }
  0xde   : > { %968 = vmatpush1.bf16.msra.mxu1 %v2034_v27 }
  0xdf   : > { %969 = vmatprep.subr.bf16.mxu1 %v2039_v30 }
  0xe0   : > { %552 = vmatmul.mubr.bf16.gmra.mrb[28].mxu0 %v333_v28  ;;  %632 = vmatmul.mubr.bf16.gmra.mrb[28].mxu1 %v341_v29 }
  0xe2   : > { %970 = vmatpush1.bf16.msra.mxu1 %v2037_v31 }
  0xe3   : > { %971 = vmatprep.subr.bf16.mxu1 %v2042_v32 }
  0xe6   : > { %972 = vmatpush1.bf16.msra.mxu1 %v2040_v33 }
 0x17b   : > { %v483_v40 = vpop.f32.mrb[0].mxu0  ;;  %v563_v41 = vpop.f32.mrb[0].mxu1 }
 0x17c   : > { %v484_v42 = vadd.f32 %v483_v40, %v2570_v38  ;;  %v485_v43 = vpop.f32.mrb[1].mxu0  ;;  %v564_v44 = vadd.f32 %v563_v41, %v2570_v38  ;;  %v565_v45 = vpop.f32.mrb[1].mxu1  ;;  %v2050_v40 = vld [vmem:[#allocation8 + $0x18] sm:$0xff]  }
 0x17d   : > { %v486_v46 = vadd.f32 %v485_v43, %v2574_v39  ;;  %v487_v47 = vpop.f32.mrb[2].mxu0  ;;  %v566_v48 = vadd.f32 %v565_v45, %v2574_v39  ;;  %v567_v49 = vpop.f32.mrb[2].mxu1  ;;  %v2051_v43 = vld [vmem:[#allocation8 + $0x60] sm:$0xff]   ;;  %1766 = vmatpush3.bf16.msra.mxu0 %v2050_v40 }
 0x17e   : > { %v488_v50 = vadd.f32 %v487_v47, %v2570_v38  ;;  %v489_v51 = vpop.f32.mrb[3].mxu0  ;;  %v674_v52 = vmax.f32 %v564_v44, 0.0  ;;  %v568_v53 = vadd.f32 %v567_v49, %v2570_v38  ;;  %v569_v54 = vpop.f32.mrb[3].mxu1  ;;  %v642_v61 = vmax.f32 %v484_v42, 0.0  ;;  %1767 = vmatprep.subr.bf16.mxu0 %v2051_v43 }
 0x17f   : > { %v490_v57 = vadd.f32 %v489_v51, %v2574_v39  ;;  %v675_v58 = vmax.f32 %v566_v48, 0.0  ;;  %v570_v59 = vadd.f32 %v569_v54, %v2574_v39  ;;  %v643_v1 = vmax.f32 %v486_v46, 0.0 }
 0x180   : > { %v644_v62 = vmax.f32 %v488_v50, 0.0  ;;  %v676_v63 = vmax.f32 %v568_v53, 0.0 }
 0x181   : > { %v645_v2 = vmax.f32 %v490_v57, 0.0  ;;  %v677_v3 = vmax.f32 %v570_v59, 0.0  ;;  %1768 = vmatpush3.bf16.msra.mxu0 %v2052_v56 }
 0x182   : > { %v706_v5 = vpack.c.bf16 %v644_v62, %v642_v61  ;;  %v2584_v6 = vpack.c.bf16 %v676_v63, %v674_v52  ;;  %v2053_v62 = vld [vmem:[#allocation8 + $0x68] sm:$0xff]  }
 0x183   : > { %v707_v8 = vpack.c.bf16 %v645_v2, %v643_v1  ;;  %v493_v9 = vpop.f32.mrb[4].mxu0  ;;  %v2586_v10 = vpack.c.bf16 %v677_v3, %v675_v58  ;;  %v573_v11 = vpop.f32.mrb[4].mxu1  ;;  %1769 = vmatprep.subr.bf16.mxu0 %v2053_v62 }
 0x184   : > { %v494_v12 = vadd.f32 %v493_v9, %v2570_v38  ;;  %v495_v13 = vpop.f32.mrb[5].mxu0  ;;  %v574_v14 = vadd.f32 %v573_v11, %v2570_v38  ;;  %v575_v15 = vpop.f32.mrb[5].mxu1  ;;  %v2054_v11 = vld [vmem:[#allocation8 + $0x28] sm:$0xff]  }
 0x185   : > { %v496_v16 = vadd.f32 %v495_v13, %v2574_v39  ;;  %v497_v17 = vpop.f32.mrb[6].mxu0  ;;  %973 = vmatprep.mubr.bf16.mxu1 %v707_v8  ;;  %v576_v18 = vadd.f32 %v575_v15, %v2574_v39  ;;  %v577_v19 = vpop.f32.mrb[6].mxu1  ;;  %1770 = vmatpush3.bf16.msra.mxu0 %v2054_v11 }
 0x186   : > { %v498_v21 = vadd.f32 %v497_v17, %v2570_v38  ;;  %v499_v22 = vpop.f32.mrb[7].mxu0  ;;  %974 = vmatmul.mubr.bf16.vlgmr.msra.gmra.mrb[32].mxu1 %v706_v5  ;;  %v678_v23 = vmax.f32 %v574_v14, 0.0  ;;  %v578_v24 = vadd.f32 %v577_v19, %v2570_v38  ;;  %v579_v25 = vpop.f32.mrb[7].mxu1  ;;  %v646_v30 = vmax.f32 %v494_v12, 0.0  ;;  %v2055_v14 = vld [vmem:[#allocation8 + $0x70] sm:$0xff]  }
 0x187   : > { %v500_v27 = vadd.f32 %v499_v22, %v2574_v39  ;;  %v679_v28 = vmax.f32 %v576_v18, 0.0  ;;  %v580_v29 = vadd.f32 %v579_v25, %v2574_v39  ;;  %v647_v33 = vmax.f32 %v496_v16, 0.0  ;;  %1771 = vmatprep.subr.bf16.mxu0 %v2055_v14 }
 0x188   : > { %v648_v31 = vmax.f32 %v498_v21, 0.0  ;;  %v680_v32 = vmax.f32 %v578_v24, 0.0 }
 0x189   : > { %v649_v34 = vmax.f32 %v500_v27, 0.0  ;;  %v681_v36 = vmax.f32 %v580_v29, 0.0  ;;  %v2056_v27 = vld [vmem:[#allocation8 + $0x30] sm:$0xff]  }
 0x18a   : > { %v708_v41 = vpack.c.bf16 %v648_v31, %v646_v30  ;;  %v2596_v42 = vpack.c.bf16 %v680_v32, %v678_v23  ;;  %1772 = vmatpush3.bf16.msra.mxu0 %v2056_v27 }
 0x18b   : > { %v709_v44 = vpack.c.bf16 %v649_v34, %v647_v33  ;;  %v503_v45 = vpop.f32.mrb[8].mxu0  ;;  %v2598_v46 = vpack.c.bf16 %v681_v36, %v679_v28  ;;  %v583_v47 = vpop.f32.mrb[8].mxu1 }
 0x18c   : > { %v504_v48 = vadd.f32 %v503_v45, %v2570_v38  ;;  %v505_v49 = vpop.f32.mrb[9].mxu0  ;;  %v584_v50 = vadd.f32 %v583_v47, %v2570_v38  ;;  %v585_v51 = vpop.f32.mrb[9].mxu1 }
 0x18d   : > { %v506_v52 = vadd.f32 %v505_v49, %v2574_v39  ;;  %v507_v53 = vpop.f32.mrb[10].mxu0  ;;  %983 = vmatprep.mubr.bf16.mxu1 %v709_v44  ;;  %v586_v54 = vadd.f32 %v585_v51, %v2574_v39  ;;  %v587_v55 = vpop.f32.mrb[10].mxu1 }
 0x18e   : > { %v508_v57 = vadd.f32 %v507_v53, %v2570_v38  ;;  %v509_v58 = vpop.f32.mrb[11].mxu0  ;;  %984 = vmatmul.mubr.bf16.gmra.mrb[36].mxu1 %v708_v41  ;;  %v682_v59 = vmax.f32 %v584_v50, 0.0  ;;  %v588_v60 = vadd.f32 %v587_v55, %v2570_v38  ;;  %v589_v61 = vpop.f32.mrb[11].mxu1  ;;  %v650_v3 = vmax.f32 %v504_v48, 0.0 }
 0x18f   : > { %v510_v63 = vadd.f32 %v509_v58, %v2574_v39  ;;  %v683_v1 = vmax.f32 %v586_v54, 0.0  ;;  %v590_v2 = vadd.f32 %v589_v61, %v2574_v39  ;;  %v651_v7 = vmax.f32 %v506_v52, 0.0 }
 0x190   : > { %v652_v4 = vmax.f32 %v508_v57, 0.0  ;;  %v684_v5 = vmax.f32 %v588_v60, 0.0 }
 0x191   : > { %v653_v8 = vmax.f32 %v510_v63, 0.0  ;;  %v685_v9 = vmax.f32 %v590_v2, 0.0 }
 0x192   : > { %v710_v12 = vpack.c.bf16 %v652_v4, %v650_v3  ;;  %v2608_v13 = vpack.c.bf16 %v684_v5, %v682_v59 }
 0x193   : > { %v711_v15 = vpack.c.bf16 %v653_v8, %v651_v7  ;;  %v513_v16 = vpop.f32.mrb[12].mxu0  ;;  %v2610_v17 = vpack.c.bf16 %v685_v9, %v683_v1  ;;  %v593_v18 = vpop.f32.mrb[12].mxu1 }
 0x194   : > { %v514_v19 = vadd.f32 %v513_v16, %v2570_v38  ;;  %v515_v20 = vpop.f32.mrb[13].mxu0  ;;  %v594_v21 = vadd.f32 %v593_v18, %v2570_v38  ;;  %v595_v22 = vpop.f32.mrb[13].mxu1 }
 0x195   : > { %v516_v23 = vadd.f32 %v515_v20, %v2574_v39  ;;  %v517_v24 = vpop.f32.mrb[14].mxu0  ;;  %993 = vmatprep.mubr.bf16.mxu1 %v711_v15  ;;  %v596_v25 = vadd.f32 %v595_v22, %v2574_v39  ;;  %v597_v26 = vpop.f32.mrb[14].mxu1 }
 0x196   : > { %v518_v28 = vadd.f32 %v517_v24, %v2570_v38  ;;  %v519_v29 = vpop.f32.mrb[15].mxu0  ;;  %994 = vmatmul.mubr.bf16.gmra.mrb[40].mxu1 %v710_v12  ;;  %v686_v30 = vmax.f32 %v594_v21, 0.0  ;;  %v598_v31 = vadd.f32 %v597_v26, %v2570_v38  ;;  %v599_v32 = vpop.f32.mrb[15].mxu1  ;;  %v654_v40 = vmax.f32 %v514_v19, 0.0 }
 0x197   : > { %v520_v33 = vadd.f32 %v519_v29, %v2574_v39  ;;  %v687_v34 = vmax.f32 %v596_v25, 0.0  ;;  %v600_v36 = vadd.f32 %v599_v32, %v2574_v39  ;;  %v655_v44 = vmax.f32 %v516_v23, 0.0 }
 0x198   : > { %v656_v41 = vmax.f32 %v518_v28, 0.0  ;;  %v688_v43 = vmax.f32 %v598_v31, 0.0 }
 0x199   : > { %v657_v45 = vmax.f32 %v520_v33, 0.0  ;;  %v689_v47 = vmax.f32 %v600_v36, 0.0 }
 0x19a   : > { %v712_v48 = vpack.c.bf16 %v656_v41, %v654_v40  ;;  %v2620_v49 = vpack.c.bf16 %v688_v43, %v686_v30 }
 0x19b   : > { %v713_v50 = vpack.c.bf16 %v657_v45, %v655_v44  ;;  %v523_v51 = vpop.f32.mrb[16].mxu0  ;;  %v2622_v52 = vpack.c.bf16 %v689_v47, %v687_v34  ;;  %v603_v53 = vpop.f32.mrb[16].mxu1 }
 0x19c   : > { %v524_v54 = vadd.f32 %v523_v51, %v2570_v38  ;;  %v525_v55 = vpop.f32.mrb[17].mxu0  ;;  %v604_v56 = vadd.f32 %v603_v53, %v2570_v38  ;;  %v605_v57 = vpop.f32.mrb[17].mxu1 }
 0x19d   : > { %v526_v58 = vadd.f32 %v525_v55, %v2574_v39  ;;  %v527_v59 = vpop.f32.mrb[18].mxu0  ;;  %1003 = vmatprep.mubr.bf16.mxu1 %v713_v50  ;;  %v606_v60 = vadd.f32 %v605_v57, %v2574_v39  ;;  %v607_v61 = vpop.f32.mrb[18].mxu1 }
 0x19e   : > { %v528_v62 = vadd.f32 %v527_v59, %v2570_v38  ;;  %v529_v63 = vpop.f32.mrb[19].mxu0  ;;  %1004 = vmatmul.mubr.bf16.gmra.mrb[44].mxu1 %v712_v48  ;;  %v690_v1 = vmax.f32 %v604_v56, 0.0  ;;  %v608_v2 = vadd.f32 %v607_v61, %v2570_v38  ;;  %v609_v3 = vpop.f32.mrb[19].mxu1  ;;  %v658_v8 = vmax.f32 %v524_v54, 0.0 }
 0x19f   : > { %v530_v4 = vadd.f32 %v529_v63, %v2574_v39  ;;  %v691_v5 = vmax.f32 %v606_v60, 0.0  ;;  %v610_v7 = vadd.f32 %v609_v3, %v2574_v39  ;;  %v659_v12 = vmax.f32 %v526_v58, 0.0 }
 0x1a0   : > { %v660_v9 = vmax.f32 %v528_v62, 0.0  ;;  %v692_v11 = vmax.f32 %v608_v2, 0.0 }
 0x1a1   : > { %v661_v14 = vmax.f32 %v530_v4, 0.0  ;;  %v693_v15 = vmax.f32 %v610_v7, 0.0 }
 0x1a2   : > { %v714_v16 = vpack.c.bf16 %v660_v9, %v658_v8  ;;  %v2632_v18 = vpack.c.bf16 %v692_v11, %v690_v1 }
 0x1a3   : > { %v715_v19 = vpack.c.bf16 %v661_v14, %v659_v12  ;;  %v533_v20 = vpop.f32.mrb[20].mxu0  ;;  %v2634_v21 = vpack.c.bf16 %v693_v15, %v691_v5  ;;  %v613_v22 = vpop.f32.mrb[20].mxu1 }
 0x1a4   : > { %v534_v23 = vadd.f32 %v533_v20, %v2570_v38  ;;  %v535_v24 = vpop.f32.mrb[21].mxu0  ;;  %v614_v25 = vadd.f32 %v613_v22, %v2570_v38  ;;  %v615_v26 = vpop.f32.mrb[21].mxu1 }
 0x1a5   : > { %v536_v27 = vadd.f32 %v535_v24, %v2574_v39  ;;  %v537_v28 = vpop.f32.mrb[22].mxu0  ;;  %1013 = vmatprep.mubr.bf16.mxu1 %v715_v19  ;;  %v616_v29 = vadd.f32 %v615_v26, %v2574_v39  ;;  %v617_v30 = vpop.f32.mrb[22].mxu1 }
 0x1a6   : > { %v538_v31 = vadd.f32 %v537_v28, %v2570_v38  ;;  %v539_v32 = vpop.f32.mrb[23].mxu0  ;;  %1014 = vmatmul.mubr.bf16.gmra.mrb[48].mxu1 %v714_v16  ;;  %v694_v33 = vmax.f32 %v614_v25, 0.0  ;;  %v618_v34 = vadd.f32 %v617_v30, %v2570_v38  ;;  %v619_v36 = vpop.f32.mrb[23].mxu1  ;;  %v662_v44 = vmax.f32 %v534_v23, 0.0 }
 0x1a7   : > { %v540_v40 = vadd.f32 %v539_v32, %v2574_v39  ;;  %v695_v41 = vmax.f32 %v616_v29, 0.0  ;;  %v620_v43 = vadd.f32 %v619_v36, %v2574_v39  ;;  %v663_v48 = vmax.f32 %v536_v27, 0.0 }
 0x1a8   : > { %v664_v45 = vmax.f32 %v538_v31, 0.0  ;;  %v696_v47 = vmax.f32 %v618_v34, 0.0 }
 0x1a9   : > { %v665_v50 = vmax.f32 %v540_v40, 0.0  ;;  %v697_v51 = vmax.f32 %v620_v43, 0.0 }
 0x1aa   : > { %v716_v53 = vpack.c.bf16 %v664_v45, %v662_v44  ;;  %v2644_v54 = vpack.c.bf16 %v696_v47, %v694_v33 }
 0x1ab   : > { %v717_v55 = vpack.c.bf16 %v665_v50, %v663_v48  ;;  %v543_v56 = vpop.f32.mrb[24].mxu0  ;;  %v2646_v57 = vpack.c.bf16 %v697_v51, %v695_v41  ;;  %v623_v58 = vpop.f32.mrb[24].mxu1 }
 0x1ac   : > { %v544_v59 = vadd.f32 %v543_v56, %v2570_v38  ;;  %v545_v60 = vpop.f32.mrb[25].mxu0  ;;  %v624_v61 = vadd.f32 %v623_v58, %v2570_v38  ;;  %v625_v62 = vpop.f32.mrb[25].mxu1 }
 0x1ad   : > { %v546_v63 = vadd.f32 %v545_v60, %v2574_v39  ;;  %v547_v1 = vpop.f32.mrb[26].mxu0  ;;  %1023 = vmatprep.mubr.bf16.mxu1 %v717_v55  ;;  %v626_v2 = vadd.f32 %v625_v62, %v2574_v39  ;;  %v627_v3 = vpop.f32.mrb[26].mxu1 }
 0x1ae   : > { %v548_v4 = vadd.f32 %v547_v1, %v2570_v38  ;;  %v549_v5 = vpop.f32.mrb[27].mxu0  ;;  %1024 = vmatmul.mubr.bf16.gmra.mrb[52].mxu1 %v716_v53  ;;  %v698_v7 = vmax.f32 %v624_v61, 0.0  ;;  %v628_v8 = vadd.f32 %v627_v3, %v2570_v38  ;;  %v629_v9 = vpop.f32.mrb[27].mxu1  ;;  %v666_v15 = vmax.f32 %v544_v59, 0.0 }
 0x1af   : > { %v550_v11 = vadd.f32 %v549_v5, %v2574_v39  ;;  %v699_v12 = vmax.f32 %v626_v2, 0.0  ;;  %v630_v14 = vadd.f32 %v629_v9, %v2574_v39  ;;  %v667_v20 = vmax.f32 %v546_v63, 0.0 }
 0x1b0   : > { %v668_v16 = vmax.f32 %v548_v4, 0.0  ;;  %v700_v19 = vmax.f32 %v628_v8, 0.0 }
 0x1b1   : > { %v669_v22 = vmax.f32 %v550_v11, 0.0  ;;  %v701_v23 = vmax.f32 %v630_v14, 0.0 }
 0x1b2   : > { %v718_v24 = vpack.c.bf16 %v668_v16, %v666_v15  ;;  %v734_v25 = vpack.c.bf16 %v700_v19, %v698_v7 }
 0x1b3   : > { %v719_v26 = vpack.c.bf16 %v669_v22, %v667_v20  ;;  %v553_v27 = vpop.f32.mrb[28].mxu0  ;;  %v735_v28 = vpack.c.bf16 %v701_v23, %v699_v12  ;;  %v633_v29 = vpop.f32.mrb[28].mxu1 }
 0x1b4   : > { %v554_v30 = vadd.f32 %v553_v27, %v2570_v38  ;;  %v555_v31 = vpop.f32.mrb[29].mxu0  ;;  %v634_v32 = vadd.f32 %v633_v29, %v2570_v38  ;;  %v635_v33 = vpop.f32.mrb[29].mxu1 }
 0x1b5   : > { %v556_v34 = vadd.f32 %v555_v31, %v2574_v39  ;;  %v557_v36 = vpop.f32.mrb[30].mxu0  ;;  %1033 = vmatprep.mubr.bf16.mxu1 %v719_v26  ;;  %v636_v40 = vadd.f32 %v635_v33, %v2574_v39  ;;  %v637_v41 = vpop.f32.mrb[30].mxu1 }
 0x1b6   : > { %v558_v43 = vadd.f32 %v557_v36, %v2570_v38  ;;  %v559_v44 = vpop.f32.mrb[31].mxu0  ;;  %1034 = vmatmul.mubr.bf16.gmra.mrb[56].mxu1 %v718_v24  ;;  %v702_v45 = vmax.f32 %v634_v32, 0.0  ;;  %v638_v47 = vadd.f32 %v637_v41, %v2570_v38  ;;  %v639_v48 = vpop.f32.mrb[31].mxu1  ;;  %v670_v55 = vmax.f32 %v554_v30, 0.0  ;;  %v2057_v38 = vld [vmem:[#allocation8 + $0x78] sm:$0xff]  }
 0x1b7   : > { %v560_v50 = vadd.f32 %v559_v44, %v2574_v39  ;;  %v703_v51 = vmax.f32 %v636_v40, 0.0  ;;  %v640_v53 = vadd.f32 %v639_v48, %v2574_v39  ;;  %v671_v59 = vmax.f32 %v556_v34, 0.0  ;;  %v2058_v39 = vld [vmem:[#allocation8 + $0x38] sm:$0xff]   ;;  %1773 = vmatprep.subr.bf16.mxu0 %v2057_v38 }
 0x1b8   : > { %v672_v56 = vmax.f32 %v558_v43, 0.0  ;;  %v704_v58 = vmax.f32 %v638_v47, 0.0  ;;  %1774 = vmatpush3.bf16.msra.mxu0 %v2058_v39 }
 0x1b9   : > { %v673_v60 = vmax.f32 %v560_v50, 0.0  ;;  %v705_v61 = vmax.f32 %v640_v53, 0.0 }
 0x1ba   : > { %v720_v62 = vpack.c.bf16 %v672_v56, %v670_v55  ;;  %v736_v63 = vpack.c.bf16 %v704_v58, %v702_v45 }
 0x1bb   : > { %v721_v1 = vpack.c.bf16 %v673_v60, %v671_v59  ;;  %v737_v2 = vpack.c.bf16 %v705_v61, %v703_v51 }
 0x1bd   : > { %1043 = vmatprep.mubr.bf16.mxu1 %v721_v1 }
 0x1be   : > { %1044 = vmatmul.mubr.bf16.gmra.mrb[60].mxu1 %v720_v62 }
 0x1bf   : > { %1053 = vmatprep.mubr.bf16.mxu1 %v2586_v10 }
 0x1c6   : > { %1054 = vmatmul.mubr.bf16.gmra.mrb[64].mxu1 %v2584_v6  ;;  %v1686_v6 = vld [vmem:[%s2879_s4 + $0x1] ss:$4 sm:$0x3] }
 0x1c7   : > { %1063 = vmatprep.mubr.bf16.mxu1 %v2598_v46  ;;  %v2681_v10 = vrot.slane %v1686_v6, %v361_v35 }
 0x1ce   : > { %1064 = vmatmul.mubr.bf16.gmra.mrb[68].mxu1 %v2596_v42  ;;  %v2685_v42 = vrot.slane %v1686_v6, %v365_v37 }
 0x1cf   : > { %1073 = vmatprep.mubr.bf16.mxu1 %v2610_v17 }
 0x1d6   : > { %1074 = vmatmul.mubr.bf16.gmra.mrb[72].mxu1 %v2608_v13 }
 0x1d7   : > { %1083 = vmatprep.mubr.bf16.mxu1 %v2622_v52 }
 0x1de   : > { %1084 = vmatmul.mubr.bf16.gmra.mrb[76].mxu1 %v2620_v49 }
 0x1df   : > { %1093 = vmatprep.mubr.bf16.mxu1 %v2634_v21 }
 0x1e6   : > { %1094 = vmatmul.mubr.bf16.gmra.mrb[80].mxu1 %v2632_v18 }
 0x1e7   : > { %1103 = vmatprep.mubr.bf16.mxu1 %v2646_v57 }
 0x1ee   : > { %1104 = vmatmul.mubr.bf16.gmra.mrb[84].mxu1 %v2644_v54 }
 0x1ef   : > { %1113 = vmatprep.mubr.bf16.mxu1 %v735_v28 }
 0x1f6   : > { %1114 = vmatmul.mubr.bf16.gmra.mrb[88].mxu1 %v734_v25 }
 0x1f7   : > { %1123 = vmatprep.mubr.bf16.mxu1 %v737_v2 }
 0x1fe   : > { %1124 = vmatmul.mubr.bf16.gmra.mrb[92].mxu1 %v736_v63 }
 0x259   : > { %v975_v46 = vpop.f32.mrb[32].mxu1 }
 0x25a   : > { %v976_v13 = vadd.f32 %v975_v46, %v2681_v10  ;;  %v977_v17 = vpop.f32.mrb[33].mxu1 }
 0x25b   : > { %v978_v49 = vadd.f32 %v977_v17, %v2685_v42  ;;  %v979_v52 = vpop.f32.mrb[34].mxu1 }
 0x25c   : > { %v980_v18 = vadd.f32 %v979_v52, %v2681_v10  ;;  %v981_v21 = vpop.f32.mrb[35].mxu1  ;;  %v1134_v57 = vmax.f32 %v976_v13, 0.0 }
 0x25d   : > { %v982_v54 = vadd.f32 %v981_v21, %v2685_v42  ;;  %v1135_v35 = vmax.f32 %v978_v49, 0.0 }
 0x25e   : > { %v1136_v3 = vmax.f32 %v980_v18, 0.0 }
 0x25f   : > { %v1137_v4 = vmax.f32 %v982_v54, 0.0 }
 0x260   : > { %v1198_v5 = vpack.c.bf16 %v1136_v3, %v1134_v57 }
 0x261   : > { %v1199_v0 = vpack.c.bf16 %v1137_v4, %v1135_v35  ;;  %v985_v37 = vpop.f32.mrb[36].mxu1 }
 0x262   : > { %v986_v7 = vadd.f32 %v985_v37, %v2681_v10  ;;  %v987_v8 = vpop.f32.mrb[37].mxu1 }
 0x263   : > { %v988_v9 = vadd.f32 %v987_v8, %v2685_v42  ;;  %v989_v11 = vpop.f32.mrb[38].mxu1  ;;  %1394 = vmatprep.mubr.bf16.mxu0 %v1199_v0 }
 0x264   : > { %v990_v12 = vadd.f32 %v989_v11, %v2681_v10  ;;  %v991_v14 = vpop.f32.mrb[39].mxu1  ;;  %1395 = vmatmul.mubr.bf16.vlgmr.msra.gmra.mrb[32].mxu0 %v1198_v5  ;;  %v1138_v16 = vmax.f32 %v986_v7, 0.0 }
 0x265   : > { %v992_v15 = vadd.f32 %v991_v14, %v2685_v42  ;;  %v1139_v20 = vmax.f32 %v988_v9, 0.0 }
 0x266   : > { %v1140_v19 = vmax.f32 %v990_v12, 0.0 }
 0x267   : > { %v1141_v22 = vmax.f32 %v992_v15, 0.0 }
 0x268   : > { %v1200_v23 = vpack.c.bf16 %v1140_v19, %v1138_v16 }
 0x269   : > { %v1201_v24 = vpack.c.bf16 %v1141_v22, %v1139_v20  ;;  %v995_v25 = vpop.f32.mrb[40].mxu1 }
 0x26a   : > { %v996_v26 = vadd.f32 %v995_v25, %v2681_v10  ;;  %v997_v27 = vpop.f32.mrb[41].mxu1 }
 0x26b   : > { %v998_v28 = vadd.f32 %v997_v27, %v2685_v42  ;;  %v999_v29 = vpop.f32.mrb[42].mxu1  ;;  %1402 = vmatprep.mubr.bf16.mxu0 %v1201_v24 }
 0x26c   : > { %v1000_v30 = vadd.f32 %v999_v29, %v2681_v10  ;;  %v1001_v31 = vpop.f32.mrb[43].mxu1  ;;  %1403 = vmatmul.mubr.bf16.gmra.mrb[36].mxu0 %v1200_v23  ;;  %v1142_v33 = vmax.f32 %v996_v26, 0.0 }
 0x26d   : > { %v1002_v32 = vadd.f32 %v1001_v31, %v2685_v42  ;;  %v1143_v36 = vmax.f32 %v998_v28, 0.0 }
 0x26e   : > { %v1144_v34 = vmax.f32 %v1000_v30, 0.0 }
 0x26f   : > { %v1145_v40 = vmax.f32 %v1002_v32, 0.0 }
 0x270   : > { %v1202_v41 = vpack.c.bf16 %v1144_v34, %v1142_v33 }
 0x271   : > { %v1203_v43 = vpack.c.bf16 %v1145_v40, %v1143_v36  ;;  %v1005_v44 = vpop.f32.mrb[44].mxu1 }
 0x272   : > { %v1006_v45 = vadd.f32 %v1005_v44, %v2681_v10  ;;  %v1007_v47 = vpop.f32.mrb[45].mxu1 }
 0x273   : > { %v1008_v48 = vadd.f32 %v1007_v47, %v2685_v42  ;;  %v1009_v50 = vpop.f32.mrb[46].mxu1  ;;  %1410 = vmatprep.mubr.bf16.mxu0 %v1203_v43 }
 0x274   : > { %v1010_v51 = vadd.f32 %v1009_v50, %v2681_v10  ;;  %v1011_v53 = vpop.f32.mrb[47].mxu1  ;;  %1411 = vmatmul.mubr.bf16.gmra.mrb[40].mxu0 %v1202_v41  ;;  %v1146_v56 = vmax.f32 %v1006_v45, 0.0 }
 0x275   : > { %v1012_v55 = vadd.f32 %v1011_v53, %v2685_v42  ;;  %v1147_v59 = vmax.f32 %v1008_v48, 0.0 }
 0x276   : > { %v1148_v58 = vmax.f32 %v1010_v51, 0.0 }
 0x277   : > { %v1149_v60 = vmax.f32 %v1012_v55, 0.0 }
 0x278   : > { %v1204_v61 = vpack.c.bf16 %v1148_v58, %v1146_v56 }
 0x279   : > { %v1205_v62 = vpack.c.bf16 %v1149_v60, %v1147_v59  ;;  %v1015_v63 = vpop.f32.mrb[48].mxu1 }
 0x27a   : > { %v1016_v1 = vadd.f32 %v1015_v63, %v2681_v10  ;;  %v1017_v2 = vpop.f32.mrb[49].mxu1 }
 0x27b   : > { %v1018_v38 = vadd.f32 %v1017_v2, %v2685_v42  ;;  %v1019_v39 = vpop.f32.mrb[50].mxu1  ;;  %1418 = vmatprep.mubr.bf16.mxu0 %v1205_v62 }
 0x27c   : > { %v1020_v6 = vadd.f32 %v1019_v39, %v2681_v10  ;;  %v1021_v46 = vpop.f32.mrb[51].mxu1  ;;  %1419 = vmatmul.mubr.bf16.gmra.mrb[44].mxu0 %v1204_v61  ;;  %v1150_v17 = vmax.f32 %v1016_v1, 0.0 }
 0x27d   : > { %v1022_v13 = vadd.f32 %v1021_v46, %v2685_v42  ;;  %v1151_v52 = vmax.f32 %v1018_v38, 0.0 }
 0x27e   : > { %v1152_v49 = vmax.f32 %v1020_v6, 0.0 }
 0x27f   : > { %v1153_v18 = vmax.f32 %v1022_v13, 0.0 }
 0x280   : > { %v1206_v21 = vpack.c.bf16 %v1152_v49, %v1150_v17 }
 0x281   : > { %v1207_v54 = vpack.c.bf16 %v1153_v18, %v1151_v52  ;;  %v1025_v57 = vpop.f32.mrb[52].mxu1 }
 0x282   : > { %v1026_v3 = vadd.f32 %v1025_v57, %v2681_v10  ;;  %v1027_v35 = vpop.f32.mrb[53].mxu1 }
 0x283   : > { %v1028_v4 = vadd.f32 %v1027_v35, %v2685_v42  ;;  %v1029_v5 = vpop.f32.mrb[54].mxu1  ;;  %1426 = vmatprep.mubr.bf16.mxu0 %v1207_v54 }
 0x284   : > { %v1030_v0 = vadd.f32 %v1029_v5, %v2681_v10  ;;  %v1031_v37 = vpop.f32.mrb[55].mxu1  ;;  %1427 = vmatmul.mubr.bf16.gmra.mrb[48].mxu0 %v1206_v21  ;;  %v1154_v8 = vmax.f32 %v1026_v3, 0.0 }
 0x285   : > { %v1032_v7 = vadd.f32 %v1031_v37, %v2685_v42  ;;  %v1155_v11 = vmax.f32 %v1028_v4, 0.0 }
 0x286   : > { %v1156_v9 = vmax.f32 %v1030_v0, 0.0 }
 0x287   : > { %v1157_v12 = vmax.f32 %v1032_v7, 0.0 }
 0x288   : > { %v1208_v14 = vpack.c.bf16 %v1156_v9, %v1154_v8 }
 0x289   : > { %v1209_v15 = vpack.c.bf16 %v1157_v12, %v1155_v11  ;;  %v1035_v16 = vpop.f32.mrb[56].mxu1 }
 0x28a   : > { %v1036_v19 = vadd.f32 %v1035_v16, %v2681_v10  ;;  %v1037_v20 = vpop.f32.mrb[57].mxu1 }
 0x28b   : > { %v1038_v22 = vadd.f32 %v1037_v20, %v2685_v42  ;;  %v1039_v23 = vpop.f32.mrb[58].mxu1  ;;  %1434 = vmatprep.mubr.bf16.mxu0 %v1209_v15 }
 0x28c   : > { %v1040_v24 = vadd.f32 %v1039_v23, %v2681_v10  ;;  %v1041_v25 = vpop.f32.mrb[59].mxu1  ;;  %1435 = vmatmul.mubr.bf16.gmra.mrb[52].mxu0 %v1208_v14  ;;  %v1158_v27 = vmax.f32 %v1036_v19, 0.0 }
 0x28d   : > { %v1042_v26 = vadd.f32 %v1041_v25, %v2685_v42  ;;  %v1159_v29 = vmax.f32 %v1038_v22, 0.0 }
 0x28e   : > { %v1160_v28 = vmax.f32 %v1040_v24, 0.0 }
 0x28f   : > { %v1161_v30 = vmax.f32 %v1042_v26, 0.0 }
 0x290   : > { %v1210_v31 = vpack.c.bf16 %v1160_v28, %v1158_v27 }
 0x291   : > { %v1211_v32 = vpack.c.bf16 %v1161_v30, %v1159_v29  ;;  %v1045_v33 = vpop.f32.mrb[60].mxu1 }
 0x292   : > { %v1046_v34 = vadd.f32 %v1045_v33, %v2681_v10  ;;  %v1047_v36 = vpop.f32.mrb[61].mxu1 }
 0x293   : > { %v1048_v40 = vadd.f32 %v1047_v36, %v2685_v42  ;;  %v1049_v41 = vpop.f32.mrb[62].mxu1  ;;  %1442 = vmatprep.mubr.bf16.mxu0 %v1211_v32 }
 0x294   : > { %v1050_v43 = vadd.f32 %v1049_v41, %v2681_v10  ;;  %v1051_v44 = vpop.f32.mrb[63].mxu1  ;;  %1443 = vmatmul.mubr.bf16.gmra.mrb[56].mxu0 %v1210_v31  ;;  %v1162_v47 = vmax.f32 %v1046_v34, 0.0 }
 0x295   : > { %v1052_v45 = vadd.f32 %v1051_v44, %v2685_v42  ;;  %v1163_v50 = vmax.f32 %v1048_v40, 0.0 }
 0x296   : > { %v1164_v48 = vmax.f32 %v1050_v43, 0.0 }
 0x297   : > { %v1165_v51 = vmax.f32 %v1052_v45, 0.0 }
 0x298   : > { %v1212_v53 = vpack.c.bf16 %v1164_v48, %v1162_v47 }
 0x299   : > { %v1213_v55 = vpack.c.bf16 %v1165_v51, %v1163_v50  ;;  %v1055_v56 = vpop.f32.mrb[64].mxu1 }
 0x29a   : > { %v1056_v58 = vadd.f32 %v1055_v56, %v2681_v10  ;;  %v1057_v59 = vpop.f32.mrb[65].mxu1 }
 0x29b   : > { %v1058_v60 = vadd.f32 %v1057_v59, %v2685_v42  ;;  %v1059_v61 = vpop.f32.mrb[66].mxu1  ;;  %1450 = vmatprep.mubr.bf16.mxu0 %v1213_v55 }
 0x29c   : > { %v1060_v62 = vadd.f32 %v1059_v61, %v2681_v10  ;;  %v1061_v63 = vpop.f32.mrb[67].mxu1  ;;  %1451 = vmatmul.mubr.bf16.gmra.mrb[60].mxu0 %v1212_v53  ;;  %v1166_v2 = vmax.f32 %v1056_v58, 0.0 }
 0x29d   : > { %v1062_v1 = vadd.f32 %v1061_v63, %v2685_v42  ;;  %v1167_v39 = vmax.f32 %v1058_v60, 0.0 }
 0x29e   : > { %v1168_v38 = vmax.f32 %v1060_v62, 0.0 }
 0x29f   : > { %v1169_v6 = vmax.f32 %v1062_v1, 0.0 }
 0x2a0   : > { %v1214_v46 = vpack.c.bf16 %v1168_v38, %v1166_v2 }
 0x2a1   : > { %v1215_v13 = vpack.c.bf16 %v1169_v6, %v1167_v39  ;;  %v1065_v17 = vpop.f32.mrb[68].mxu1 }
 0x2a2   : > { %v1066_v49 = vadd.f32 %v1065_v17, %v2681_v10  ;;  %v1067_v52 = vpop.f32.mrb[69].mxu1 }
 0x2a3   : > { %v1068_v18 = vadd.f32 %v1067_v52, %v2685_v42  ;;  %v1069_v21 = vpop.f32.mrb[70].mxu1  ;;  %1458 = vmatprep.mubr.bf16.mxu0 %v1215_v13 }
 0x2a4   : > { %v1070_v54 = vadd.f32 %v1069_v21, %v2681_v10  ;;  %v1071_v57 = vpop.f32.mrb[71].mxu1  ;;  %1459 = vmatmul.mubr.bf16.gmra.mrb[64].mxu0 %v1214_v46  ;;  %v1170_v35 = vmax.f32 %v1066_v49, 0.0 }
 0x2a5   : > { %v1072_v3 = vadd.f32 %v1071_v57, %v2685_v42  ;;  %v1171_v5 = vmax.f32 %v1068_v18, 0.0 }
 0x2a6   : > { %v1172_v4 = vmax.f32 %v1070_v54, 0.0 }
 0x2a7   : > { %v1173_v0 = vmax.f32 %v1072_v3, 0.0 }
 0x2a8   : > { %v1216_v37 = vpack.c.bf16 %v1172_v4, %v1170_v35 }
 0x2a9   : > { %v1217_v7 = vpack.c.bf16 %v1173_v0, %v1171_v5  ;;  %v1075_v8 = vpop.f32.mrb[72].mxu1 }
 0x2aa   : > { %v1076_v9 = vadd.f32 %v1075_v8, %v2681_v10  ;;  %v1077_v11 = vpop.f32.mrb[73].mxu1 }
 0x2ab   : > { %v1078_v12 = vadd.f32 %v1077_v11, %v2685_v42  ;;  %v1079_v14 = vpop.f32.mrb[74].mxu1  ;;  %1466 = vmatprep.mubr.bf16.mxu0 %v1217_v7 }
 0x2ac   : > { %v1080_v15 = vadd.f32 %v1079_v14, %v2681_v10  ;;  %v1081_v16 = vpop.f32.mrb[75].mxu1  ;;  %1467 = vmatmul.mubr.bf16.gmra.mrb[68].mxu0 %v1216_v37  ;;  %v1174_v20 = vmax.f32 %v1076_v9, 0.0 }
 0x2ad   : > { %v1082_v19 = vadd.f32 %v1081_v16, %v2685_v42  ;;  %v1175_v23 = vmax.f32 %v1078_v12, 0.0 }
 0x2ae   : > { %v1176_v22 = vmax.f32 %v1080_v15, 0.0 }
 0x2af   : > { %v1177_v24 = vmax.f32 %v1082_v19, 0.0 }
 0x2b0   : > { %v1218_v25 = vpack.c.bf16 %v1176_v22, %v1174_v20 }
 0x2b1   : > { %v1219_v26 = vpack.c.bf16 %v1177_v24, %v1175_v23  ;;  %v1085_v27 = vpop.f32.mrb[76].mxu1 }
 0x2b2   : > { %v1086_v28 = vadd.f32 %v1085_v27, %v2681_v10  ;;  %v1087_v29 = vpop.f32.mrb[77].mxu1 }
 0x2b3   : > { %v1088_v30 = vadd.f32 %v1087_v29, %v2685_v42  ;;  %v1089_v31 = vpop.f32.mrb[78].mxu1  ;;  %1474 = vmatprep.mubr.bf16.mxu0 %v1219_v26 }
 0x2b4   : > { %v1090_v32 = vadd.f32 %v1089_v31, %v2681_v10  ;;  %v1091_v33 = vpop.f32.mrb[79].mxu1  ;;  %1475 = vmatmul.mubr.bf16.gmra.mrb[72].mxu0 %v1218_v25  ;;  %v1178_v36 = vmax.f32 %v1086_v28, 0.0 }
 0x2b5   : > { %v1092_v34 = vadd.f32 %v1091_v33, %v2685_v42  ;;  %v1179_v41 = vmax.f32 %v1088_v30, 0.0 }
 0x2b6   : > { %v1180_v40 = vmax.f32 %v1090_v32, 0.0 }
 0x2b7   : > { %v1181_v43 = vmax.f32 %v1092_v34, 0.0 }
 0x2b8   : > { %v1220_v44 = vpack.c.bf16 %v1180_v40, %v1178_v36  ;;  %v2754_v40 = vld [vmem:[%s2879_s4 + $0x2] ss:$0 sm:$0xff] }
 0x2b9   : > { %v1221_v45 = vpack.c.bf16 %v1181_v43, %v1179_v41  ;;  %v1095_v47 = vpop.f32.mrb[80].mxu1 }
 0x2ba   : > { %v1096_v48 = vadd.f32 %v1095_v47, %v2681_v10  ;;  %v1097_v50 = vpop.f32.mrb[81].mxu1 }
 0x2bb   : > { %v1098_v51 = vadd.f32 %v1097_v50, %v2685_v42  ;;  %v1099_v53 = vpop.f32.mrb[82].mxu1  ;;  %1482 = vmatprep.mubr.bf16.mxu0 %v1221_v45 }
 0x2bc   : > { %v1100_v55 = vadd.f32 %v1099_v53, %v2681_v10  ;;  %v1101_v56 = vpop.f32.mrb[83].mxu1  ;;  %1483 = vmatmul.mubr.bf16.gmra.mrb[76].mxu0 %v1220_v44  ;;  %v1182_v59 = vmax.f32 %v1096_v48, 0.0 }
 0x2bd   : > { %v1102_v58 = vadd.f32 %v1101_v56, %v2685_v42  ;;  %v1183_v61 = vmax.f32 %v1098_v51, 0.0 }
 0x2be   : > { %v1184_v60 = vmax.f32 %v1100_v55, 0.0 }
 0x2bf   : > { %v1185_v62 = vmax.f32 %v1102_v58, 0.0 }
 0x2c0   : > { %v1222_v63 = vpack.c.bf16 %v1184_v60, %v1182_v59 }
 0x2c1   : > { %v1223_v1 = vpack.c.bf16 %v1185_v62, %v1183_v61  ;;  %v1105_v2 = vpop.f32.mrb[84].mxu1 }
 0x2c2   : > { %v1106_v38 = vadd.f32 %v1105_v2, %v2681_v10  ;;  %v1107_v39 = vpop.f32.mrb[85].mxu1 }
 0x2c3   : > { %v1108_v6 = vadd.f32 %v1107_v39, %v2685_v42  ;;  %v1109_v46 = vpop.f32.mrb[86].mxu1  ;;  %1490 = vmatprep.mubr.bf16.mxu0 %v1223_v1 }
 0x2c4   : > { %v1110_v13 = vadd.f32 %v1109_v46, %v2681_v10  ;;  %v1111_v17 = vpop.f32.mrb[87].mxu1  ;;  %1491 = vmatmul.mubr.bf16.gmra.mrb[80].mxu0 %v1222_v63  ;;  %v1186_v52 = vmax.f32 %v1106_v38, 0.0 }
 0x2c5   : > { %v1112_v49 = vadd.f32 %v1111_v17, %v2685_v42  ;;  %v1187_v21 = vmax.f32 %v1108_v6, 0.0 }
 0x2c6   : > { %v1188_v18 = vmax.f32 %v1110_v13, 0.0 }
 0x2c7   : > { %v1189_v54 = vmax.f32 %v1112_v49, 0.0 }
 0x2c8   : > { %v1224_v57 = vpack.c.bf16 %v1188_v18, %v1186_v52 }
 0x2c9   : > { %v1225_v3 = vpack.c.bf16 %v1189_v54, %v1187_v21  ;;  %v1115_v35 = vpop.f32.mrb[88].mxu1 }
 0x2ca   : > { %v1116_v4 = vadd.f32 %v1115_v35, %v2681_v10  ;;  %v1117_v5 = vpop.f32.mrb[89].mxu1 }
 0x2cb   : > { %v1118_v0 = vadd.f32 %v1117_v5, %v2685_v42  ;;  %v1119_v37 = vpop.f32.mrb[90].mxu1  ;;  %1498 = vmatprep.mubr.bf16.mxu0 %v1225_v3 }
 0x2cc   : > { %v1120_v7 = vadd.f32 %v1119_v37, %v2681_v10  ;;  %v1121_v8 = vpop.f32.mrb[91].mxu1  ;;  %1499 = vmatmul.mubr.bf16.gmra.mrb[84].mxu0 %v1224_v57  ;;  %v1190_v11 = vmax.f32 %v1116_v4, 0.0 }
 0x2cd   : > { %v1122_v9 = vadd.f32 %v1121_v8, %v2685_v42  ;;  %v1191_v14 = vmax.f32 %v1118_v0, 0.0 }
 0x2ce   : > { %v1192_v12 = vmax.f32 %v1120_v7, 0.0 }
 0x2cf   : > { %v1193_v15 = vmax.f32 %v1122_v9, 0.0 }
 0x2d0   : > { %v1226_v16 = vpack.c.bf16 %v1192_v12, %v1190_v11 }
 0x2d1   : > { %v1227_v19 = vpack.c.bf16 %v1193_v15, %v1191_v14  ;;  %v1125_v20 = vpop.f32.mrb[92].mxu1 }
 0x2d2   : > { %v1126_v22 = vadd.f32 %v1125_v20, %v2681_v10  ;;  %v1127_v23 = vpop.f32.mrb[93].mxu1 }
 0x2d3   : > { %v1128_v24 = vadd.f32 %v1127_v23, %v2685_v42  ;;  %v1129_v25 = vpop.f32.mrb[94].mxu1  ;;  %1506 = vmatprep.mubr.bf16.mxu0 %v1227_v19 }
 0x2d4   : > { %v1130_v26 = vadd.f32 %v1129_v25, %v2681_v10  ;;  %v1131_v27 = vpop.f32.mrb[95].mxu1  ;;  %1507 = vmatmul.mubr.bf16.gmra.mrb[88].mxu0 %v1226_v16  ;;  %v1194_v29 = vmax.f32 %v1126_v22, 0.0 }
 0x2d5   : > { %v1132_v28 = vadd.f32 %v1131_v27, %v2685_v42  ;;  %v1195_v31 = vmax.f32 %v1128_v24, 0.0 }
 0x2d6   : > { %v1196_v30 = vmax.f32 %v1130_v26, 0.0 }
 0x2d7   : > { %v1197_v32 = vmax.f32 %v1132_v28, 0.0 }
 0x2d8   : > { %v1228_v33 = vpack.c.bf16 %v1196_v30, %v1194_v29 }
 0x2d9   : > { %v1229_v34 = vpack.c.bf16 %v1197_v32, %v1195_v31 }
 0x2db   : > { %1514 = vmatprep.mubr.bf16.mxu0 %v1229_v34 }
 0x2dc   : > { %1515 = vmatmul.mubr.bf16.gmra.mrb[92].mxu0 %v1228_v33 }
 0x337   : > { %v1775_v36 = vpop.f32.mrb[32].mxu0 }
 0x338   : > { %v1776_v10 = vpop.f32.mrb[33].mxu0 }
 0x339   : > { %v1777_v41 = vadd.f32 %v1776_v10, %v1775_v36  ;;  %v1778_v43 = vpop.f32.mrb[34].mxu0 }
 0x33a   : > { %v1779_v44 = vpop.f32.mrb[35].mxu0 }
 0x33b   : > { %v1397_v42 = vadd.f32 %v1777_v41, %v2754_v40  ;;  %v1780_v45 = vadd.f32 %v1779_v44, %v1778_v43 }
 0x33d   : > { %1523 = vst [vmem:[%s2759_s17] sm:$0xff] %v1397_v42  ;;  %v1400_v47 = vadd.f32 %v1780_v45, %v2754_v40 }
 0x33f   : > { %1524 = vst [vmem:[%s2759_s17 + $0x8] sm:$0xff] %v1400_v47  ;;  %v1781_v48 = vpop.f32.mrb[36].mxu0 }
 0x340   : > { %v1782_v50 = vpop.f32.mrb[37].mxu0 }
 0x341   : > { %v1783_v51 = vadd.f32 %v1782_v50, %v1781_v48  ;;  %v1784_v53 = vpop.f32.mrb[38].mxu0 }
 0x342   : > { %v1785_v55 = vpop.f32.mrb[39].mxu0 }
 0x343   : > { %v1405_v56 = vadd.f32 %v1783_v51, %v2754_v40  ;;  %v1786_v58 = vadd.f32 %v1785_v55, %v1784_v53 }
 0x345   : > { %1525 = vst [vmem:[%s2759_s17 + $0x10] sm:$0xff] %v1405_v56  ;;  %v1408_v59 = vadd.f32 %v1786_v58, %v2754_v40 }
 0x347   : > { %1526 = vst [vmem:[%s2759_s17 + $0x18] sm:$0xff] %v1408_v59  ;;  %v1787_v60 = vpop.f32.mrb[40].mxu0 }
 0x348   : > { %v1788_v61 = vpop.f32.mrb[41].mxu0 }
 0x349   : > { %v1789_v62 = vadd.f32 %v1788_v61, %v1787_v60  ;;  %v1790_v63 = vpop.f32.mrb[42].mxu0 }
 0x34a   : > { %v1791_v1 = vpop.f32.mrb[43].mxu0 }
 0x34b   : > { %v1413_v2 = vadd.f32 %v1789_v62, %v2754_v40  ;;  %v1792_v38 = vadd.f32 %v1791_v1, %v1790_v63 }
 0x34d   : > { %1527 = vst [vmem:[%s2759_s17 + $0x20] sm:$0xff] %v1413_v2  ;;  %v1416_v39 = vadd.f32 %v1792_v38, %v2754_v40 }
 0x34f   : > { %1528 = vst [vmem:[%s2759_s17 + $0x28] sm:$0xff] %v1416_v39  ;;  %v1793_v6 = vpop.f32.mrb[44].mxu0 }
 0x350   : > { %v1794_v46 = vpop.f32.mrb[45].mxu0 }
 0x351   : > { %v1795_v13 = vadd.f32 %v1794_v46, %v1793_v6  ;;  %v1796_v17 = vpop.f32.mrb[46].mxu0 }
 0x352   : > { %v1797_v49 = vpop.f32.mrb[47].mxu0 }
 0x353   : > { %v1421_v52 = vadd.f32 %v1795_v13, %v2754_v40  ;;  %v1798_v18 = vadd.f32 %v1797_v49, %v1796_v17 }
 0x355   : > { %1529 = vst [vmem:[%s2759_s17 + $0x30] sm:$0xff] %v1421_v52  ;;  %v1424_v21 = vadd.f32 %v1798_v18, %v2754_v40 }
 0x357   : > { %1530 = vst [vmem:[%s2759_s17 + $0x38] sm:$0xff] %v1424_v21  ;;  %v1799_v54 = vpop.f32.mrb[48].mxu0 }
 0x358   : > { %v1800_v57 = vpop.f32.mrb[49].mxu0 }
 0x359   : > { %v1801_v3 = vadd.f32 %v1800_v57, %v1799_v54  ;;  %v1802_v35 = vpop.f32.mrb[50].mxu0 }
 0x35a   : > { %v1803_v4 = vpop.f32.mrb[51].mxu0 }
 0x35b   : > { %v1429_v5 = vadd.f32 %v1801_v3, %v2754_v40  ;;  %v1804_v0 = vadd.f32 %v1803_v4, %v1802_v35 }
 0x35d   : > { %1531 = vst [vmem:[%s2759_s17 + $0x40] sm:$0xff] %v1429_v5  ;;  %v1432_v37 = vadd.f32 %v1804_v0, %v2754_v40 }
 0x35f   : > { %1532 = vst [vmem:[%s2759_s17 + $0x48] sm:$0xff] %v1432_v37  ;;  %v1805_v7 = vpop.f32.mrb[52].mxu0 }
 0x360   : > { %v1806_v8 = vpop.f32.mrb[53].mxu0 }
 0x361   : > { %v1807_v9 = vadd.f32 %v1806_v8, %v1805_v7  ;;  %v1808_v11 = vpop.f32.mrb[54].mxu0 }
 0x362   : > { %v1809_v12 = vpop.f32.mrb[55].mxu0 }
 0x363   : > { %v1437_v14 = vadd.f32 %v1807_v9, %v2754_v40  ;;  %v1810_v15 = vadd.f32 %v1809_v12, %v1808_v11 }
 0x365   : > { %1533 = vst [vmem:[%s2759_s17 + $0x50] sm:$0xff] %v1437_v14  ;;  %v1440_v16 = vadd.f32 %v1810_v15, %v2754_v40 }
 0x367   : > { %1534 = vst [vmem:[%s2759_s17 + $0x58] sm:$0xff] %v1440_v16  ;;  %v1811_v19 = vpop.f32.mrb[56].mxu0 }
 0x368   : > { %v1812_v20 = vpop.f32.mrb[57].mxu0 }
 0x369   : > { %v1813_v22 = vadd.f32 %v1812_v20, %v1811_v19  ;;  %v1814_v23 = vpop.f32.mrb[58].mxu0 }
 0x36a   : > { %v1815_v24 = vpop.f32.mrb[59].mxu0 }
 0x36b   : > { %v1445_v25 = vadd.f32 %v1813_v22, %v2754_v40  ;;  %v1816_v26 = vadd.f32 %v1815_v24, %v1814_v23 }
 0x36d   : > { %1535 = vst [vmem:[%s2759_s17 + $0x60] sm:$0xff] %v1445_v25  ;;  %v1448_v27 = vadd.f32 %v1816_v26, %v2754_v40 }
 0x36f   : > { %1536 = vst [vmem:[%s2759_s17 + $0x68] sm:$0xff] %v1448_v27  ;;  %v1817_v28 = vpop.f32.mrb[60].mxu0 }
 0x370   : > { %v1818_v29 = vpop.f32.mrb[61].mxu0 }
 0x371   : > { %v1819_v30 = vadd.f32 %v1818_v29, %v1817_v28  ;;  %v1820_v31 = vpop.f32.mrb[62].mxu0 }
 0x372   : > { %v1821_v32 = vpop.f32.mrb[63].mxu0 }
 0x373   : > { %v1453_v33 = vadd.f32 %v1819_v30, %v2754_v40  ;;  %v1822_v34 = vadd.f32 %v1821_v32, %v1820_v31 }
 0x375   : > { %1537 = vst [vmem:[%s2759_s17 + $0x70] sm:$0xff] %v1453_v33  ;;  %v1456_v36 = vadd.f32 %v1822_v34, %v2754_v40 }
 0x377   : > { %1538 = vst [vmem:[%s2759_s17 + $0x78] sm:$0xff] %v1456_v36  ;;  %v1823_v10 = vpop.f32.mrb[64].mxu0 }
 0x378   : > { %v1824_v41 = vpop.f32.mrb[65].mxu0 }
 0x379   : > { %v1825_v43 = vadd.f32 %v1824_v41, %v1823_v10  ;;  %v1826_v44 = vpop.f32.mrb[66].mxu0 }
 0x37a   : > { %v1827_v42 = vpop.f32.mrb[67].mxu0 }
 0x37b   : > { %v1461_v45 = vadd.f32 %v1825_v43, %v2754_v40  ;;  %v1828_v47 = vadd.f32 %v1827_v42, %v1826_v44 }
 0x37d   : > { %1539 = vst [vmem:[%s2759_s17 + $0x80] sm:$0xff] %v1461_v45  ;;  %v1464_v48 = vadd.f32 %v1828_v47, %v2754_v40 }
 0x37f   : > { %1540 = vst [vmem:[%s2759_s17 + $0x88] sm:$0xff] %v1464_v48  ;;  %v1829_v50 = vpop.f32.mrb[68].mxu0 }
 0x380   : > { %v1830_v51 = vpop.f32.mrb[69].mxu0 }
 0x381   : > { %v1831_v53 = vadd.f32 %v1830_v51, %v1829_v50  ;;  %v1832_v55 = vpop.f32.mrb[70].mxu0 }
 0x382   : > { %v1833_v56 = vpop.f32.mrb[71].mxu0 }
 0x383   : > { %v1469_v58 = vadd.f32 %v1831_v53, %v2754_v40  ;;  %v1834_v59 = vadd.f32 %v1833_v56, %v1832_v55 }
 0x385   : > { %1541 = vst [vmem:[%s2759_s17 + $0x90] sm:$0xff] %v1469_v58  ;;  %v1472_v60 = vadd.f32 %v1834_v59, %v2754_v40 }
 0x387   : > { %1542 = vst [vmem:[%s2759_s17 + $0x98] sm:$0xff] %v1472_v60  ;;  %v1835_v61 = vpop.f32.mrb[72].mxu0 }
 0x388   : > { %v1836_v62 = vpop.f32.mrb[73].mxu0 }
 0x389   : > { %v1837_v63 = vadd.f32 %v1836_v62, %v1835_v61  ;;  %v1838_v1 = vpop.f32.mrb[74].mxu0 }
 0x38a   : > { %v1839_v2 = vpop.f32.mrb[75].mxu0 }
 0x38b   : > { %v1477_v38 = vadd.f32 %v1837_v63, %v2754_v40  ;;  %v1840_v39 = vadd.f32 %v1839_v2, %v1838_v1 }
 0x38d   : > { %1543 = vst [vmem:[%s2759_s17 + $0xa0] sm:$0xff] %v1477_v38  ;;  %v1480_v6 = vadd.f32 %v1840_v39, %v2754_v40 }
 0x38f   : > { %1544 = vst [vmem:[%s2759_s17 + $0xa8] sm:$0xff] %v1480_v6  ;;  %v1841_v46 = vpop.f32.mrb[76].mxu0 }
 0x390   : > { %v1842_v13 = vpop.f32.mrb[77].mxu0 }
 0x391   : > { %v1843_v17 = vadd.f32 %v1842_v13, %v1841_v46  ;;  %v1844_v49 = vpop.f32.mrb[78].mxu0 }
 0x392   : > { %v1845_v52 = vpop.f32.mrb[79].mxu0 }
 0x393   : > { %v1485_v18 = vadd.f32 %v1843_v17, %v2754_v40  ;;  %v1846_v21 = vadd.f32 %v1845_v52, %v1844_v49 }
 0x395   : > { %1545 = vst [vmem:[%s2759_s17 + $0xb0] sm:$0xff] %v1485_v18  ;;  %v1488_v54 = vadd.f32 %v1846_v21, %v2754_v40 }
 0x397   : > { %1546 = vst [vmem:[%s2759_s17 + $0xb8] sm:$0xff] %v1488_v54  ;;  %v1847_v57 = vpop.f32.mrb[80].mxu0 }
 0x398   : > { %v1848_v3 = vpop.f32.mrb[81].mxu0 }
 0x399   : > { %v1849_v35 = vadd.f32 %v1848_v3, %v1847_v57  ;;  %v1850_v4 = vpop.f32.mrb[82].mxu0 }
 0x39a   : > { %v1851_v5 = vpop.f32.mrb[83].mxu0 }
 0x39b   : > { %v1493_v0 = vadd.f32 %v1849_v35, %v2754_v40  ;;  %v1852_v37 = vadd.f32 %v1851_v5, %v1850_v4 }
 0x39d   : > { %1547 = vst [vmem:[%s2759_s17 + $0xc0] sm:$0xff] %v1493_v0  ;;  %v1496_v7 = vadd.f32 %v1852_v37, %v2754_v40 }
 0x39f   : > { %1548 = vst [vmem:[%s2759_s17 + $0xc8] sm:$0xff] %v1496_v7  ;;  %v1853_v8 = vpop.f32.mrb[84].mxu0 }
 0x3a0   : > { %v1854_v9 = vpop.f32.mrb[85].mxu0 }
 0x3a1   : > { %v1855_v11 = vadd.f32 %v1854_v9, %v1853_v8  ;;  %v1856_v12 = vpop.f32.mrb[86].mxu0 }
 0x3a2   : > { %v1857_v14 = vpop.f32.mrb[87].mxu0 }
 0x3a3   : > { %v1501_v15 = vadd.f32 %v1855_v11, %v2754_v40  ;;  %v1858_v16 = vadd.f32 %v1857_v14, %v1856_v12 }
 0x3a5   : > { %1549 = vst [vmem:[%s2759_s17 + $0xd0] sm:$0xff] %v1501_v15  ;;  %v1504_v19 = vadd.f32 %v1858_v16, %v2754_v40 }
 0x3a7   : > { %1550 = vst [vmem:[%s2759_s17 + $0xd8] sm:$0xff] %v1504_v19  ;;  %v1859_v20 = vpop.f32.mrb[88].mxu0 }
 0x3a8   : > { %v1860_v22 = vpop.f32.mrb[89].mxu0 }
 0x3a9   : > { %v1861_v23 = vadd.f32 %v1860_v22, %v1859_v20  ;;  %v1862_v24 = vpop.f32.mrb[90].mxu0 }
 0x3aa   : > { %v1863_v25 = vpop.f32.mrb[91].mxu0 }
 0x3ab   : > { %v1509_v26 = vadd.f32 %v1861_v23, %v2754_v40  ;;  %v1864_v27 = vadd.f32 %v1863_v25, %v1862_v24 }
 0x3ad   : > { %1551 = vst [vmem:[%s2759_s17 + $0xe0] sm:$0xff] %v1509_v26  ;;  %v1512_v28 = vadd.f32 %v1864_v27, %v2754_v40 }
 0x3af   : > { %1552 = vst [vmem:[%s2759_s17 + $0xe8] sm:$0xff] %v1512_v28  ;;  %v1865_v29 = vpop.f32.mrb[92].mxu0 }
 0x3b0   : > { %v1866_v30 = vpop.f32.mrb[93].mxu0 }
 0x3b1   : > { %v1867_v31 = vadd.f32 %v1866_v30, %v1865_v29  ;;  %v1868_v32 = vpop.f32.mrb[94].mxu0 }
 0x3b2   : > { %v1869_v33 = vpop.f32.mrb[95].mxu0 }
 0x3b3   : > { %v1517_v34 = vadd.f32 %v1867_v31, %v2754_v40  ;;  %v1870_v36 = vadd.f32 %v1869_v33, %v1868_v32 }
 0x3b5   : > { %1553 = vst [vmem:[%s2759_s17 + $0xf0] sm:$0xff] %v1517_v34  ;;  %v1520_v10 = vadd.f32 %v1870_v36, %v2754_v40 }
 0x3b7   : > { %1554 = vst [vmem:[%s2759_s17 + $0xf8] sm:$0xff] %v1520_v10 }
 0x3b8   : > { %2186 = shalt.err (!%p2183_p4)
}
 0x3b9   : > { %s2187_s26 = scalar_lea.hbm %s2826_s12, 4096  ;;  %s2191_s16 = scalar_lea.hbm %s2880_s5, 8192 }
 0x3ba   : > { %p2188_p9 = scmp.ne.s32.totalorder %s2826_s12, %s2187_s26  ;;  %p2192_p8 = scmp.lt.u32.totalorder %s2826_s12, %s2880_s5 }
 0x3bb   : > { %p2193_p13 = scmp.lt.u32.totalorder %s2191_s16, %s2187_s26  ;;  %p2195_p10 = scmp.lt.u32.totalorder %s2187_s26, %s2826_s12 }
 0x3bc   : > { %p2189_p0 = pnand %p2188_p9, %p2442_p5 }
 0x3bd   : > { %p2194_p6 = por %p2193_p13, %p2192_p8 }
 0x3be   : > { %p2190_p11 = pneg %p2189_p0 }
 0x3bf   : > { %p2196_p3 = por %p2195_p10, %p2194_p6 }
 0x3c1   : > { %p2197_p7 = pnand %p2196_p3, %p2190_p11 }
 0x3c3   : > { %2200 = shalt.err (!%p2197_p7)
}
 0x3c4   : > { %s2259_s15 = smov 128   ;;  %s2260_s6 = smov 8  }
 0x3c5   : > { %1901 = dma.vmem_to_hbm [thread:$0]  (%p2442_p5), %s2828_s29, 4096, %s2826_s12, %s1556_s22, %s2259_s15, %s2259_s15, %s2260_s6  }
 0x3c6 PF: > { %s1584_s9 = sand.u32 1, %s2235_s18   ;;  %p2898_p12 = scmp.ne.s32.totalorder %s2885_s25, 0 }
 0x3c7   : > { %p2899_p1 = scmp.ge.s32.totalorder %s2247_s21, 2  ;;  %s1585_s8 = scalar_lea.sflag [#allocation4], %s1584_s9 }
 0x3c9   : > { %p1918_p2 = pnand %p2899_p1, %p2898_p12 }
 0x3cb   : > { %2230 = dma.done.wait (!%p1918_p2), %s1585_s8, 4096  }
 0x3cc   : > { %2232 = vsyncadd (!%p1918_p2), %s1585_s8, 4294963200  ;;  %p20_p4 = scmp.ge.s32.totalorder %s2428_s30, 4   ;;  %s2900_s18 = smov %s2239_s19 }
 0x3cd   : > { %s2901_s19 = smov %s2243_s20  ;;  %s2902_s20 = smov %s2438_s10 }
 0x3ce   : > { %s2903_s21 = smov %s2428_s30  ;;  %22 = sbr.rel (!%p20_p4) target bundleno = 7 (0x7), region = 98 }
 0x3d5   :  { %1590 = vsyncpa [#allocation3], 1 }
 0x3d6   :  { %1592 = vsyncpa [#allocation3 + $0x1], 1 }
 0x3d7   :  { %1593 = vsyncpa [#allocation6], 1 }
 0x3d8   :  { %1594 = vsyncpa [#allocation9], 1 }
 0x3d9   :  { %1595 = vsyncpa [#allocation4], 1 }
 0x3da   :  { %1597 = vsyncpa [#allocation4 + $0x1], 1 }

</bundles_post_ra>
